<compile_context>
chip_gen: v7x
topology: tpu7x:2x2x1
jax: 0.10.0
libtpu: 0.0.40
codegen_flags: <defaults>
</compile_context>

<pallas_src>
import functools

import jax
import jax.numpy as jnp
from jax.experimental import pallas as pl
from jax.experimental.pallas import tpu as pltpu


def _bilinear_pooling_kernel(x_ref, wa_ref, ba_ref, wb_ref, bb_ref,
                             wl_ref, bl_ref, out_ref,
                             *, b_tile, in_ch, seq, c_m, c_n):
    # x_ref:   (B_TILE, C, L)  bf16 — native (batch, channel, seq) layout
    # wa_ref:  (C, c_m)  bf16  — convA weight, pre-transposed
    # ba_ref:  (1, c_m)  f32
    # wb_ref:  (C, c_n)  bf16  — convB weight, pre-transposed
    # bb_ref:  (1, c_n)  f32
    # wl_ref:  (c_m, out_ch) f32 — (Wl^T) * (1/c_n)  [trailing mean folded in]
    # bl_ref:  (1, out_ch) f32
    # out_ref: (B_TILE, out_ch) f32
    x = x_ref[...]                                                    # (B, C, L)

    # In-kernel (0,2,1) transpose of the resident tile; replaces the HBM
    # round-trip the old wrapper-side transpose cost.  Flatten to 2D so both
    # convs are plain row-major MXU matmuls.
    x2d = jnp.transpose(x, (0, 2, 1)).reshape(b_tile * seq, in_ch)    # (B*L, C)

    # Two separate 1x1 convs (bf16 in / f32 accumulation); avoids the
    # non-128-aligned lane slice a stacked [Wa;Wb] matmul would need.
    a = jnp.dot(x2d, wa_ref[...], preferred_element_type=jnp.float32)
    a = a + ba_ref[...]                                               # (B*L, c_m)
    b = jnp.dot(x2d, wb_ref[...], preferred_element_type=jnp.float32)
    b = b + bb_ref[...]                                               # (B*L, c_n)

    # Split rows back into (batch, seq); cheap when L is sublane-aligned.
    a3 = a.reshape(b_tile, seq, c_m)                                  # (B, L, c_m)
    b3 = b.reshape(b_tile, seq, c_n)                                  # (B, L, c_n)

    # Numerically stable softmax over L (per batch element, per c_n channel),
    # all in f32.  approx reciprocal runs on the EUP slot.
    b_max = jnp.max(b3, axis=1, keepdims=True)                        # (B, 1, c_n)
    e = jnp.exp(b3 - b_max)                                           # (B, L, c_n)
    denom = jnp.sum(e, axis=1, keepdims=True)                         # (B, 1, c_n)
    att = e * pl.reciprocal(denom, approx=True)                       # (B, L, c_n)

    # Fusion: mean_n(A @ att^T) == A @ mean_n(att); the 1/c_n lives in wl_ref,
    # so only a plain sum over the c_n lanes is needed here.
    v = jnp.sum(att, axis=2, keepdims=True)                           # (B, L, 1)
    g = jnp.sum(a3 * v, axis=1)                                       # (B, c_m)

    # Final linear with pre-transposed, pre-scaled Wl.
    out = jnp.dot(g, wl_ref[...], preferred_element_type=jnp.float32)
    out_ref[...] = out + bl_ref[...]                                  # (B, out_ch)


def _pick_b_tile(batch, in_ch, seq, x_itemsize, budget_bytes=20 * 1024 * 1024):
    """Largest batch tile (divisor of `batch`) whose per-step VMEM working set
    fits `budget_bytes`.

    Fewest / largest grid steps: on single-TC chips (v5e/v6e) the grid is a
    serial loop, so extra steps are pure per-step (~0.35 us) overhead.  The
    budget keeps tiles safe on v7x (64 MiB physical / 32 MiB scoped default)
    despite the 128-lane padding of the tiny channel dims.
    """
    def pad(v, m):
        return -(-v // m) * m

    sub = 16 if x_itemsize == 2 else 8
    # Per batch element (lane/sublane-padded), rough upper bound:
    #   x block, double-buffered:            2 * pad(C, sub) * pad(L, 128) * isz
    #   transposed/reshaped x rows:          pad(L, sub) * 128 * isz
    #   A, B, exp, att, a3*v (f32 @128 ln):  5 * pad(L, 8) * 128 * 4
    #   output rows, double-buffered:        2 * 128 * 4
    per_elem = (2 * pad(in_ch, sub) * pad(seq, 128) * x_itemsize
                + pad(seq, sub) * 128 * x_itemsize
                + 5 * pad(seq, 8) * 128 * 4
                + 2 * 128 * 4)
    max_bt = max(1, budget_bytes // per_elem)
    if batch <= max_bt:
        return batch                       # whole batch: a single grid step
    # Must split: keep the (b_tile, out_ch) output block sublane-aligned
    # (b_tile % 8 == 0) and dividing batch.
    best = 0
    for cand in range(8, batch, 8):
        if batch % cand == 0 and cand <= max_bt:
            best = cand
    if best == 0:
        # No aligned divisor fits the budget: take the smallest aligned divisor
        # (the 32 MiB VMEM limit below leaves headroom over the 20 MiB budget),
        # or fall back to the whole batch.
        for cand in range(8, batch, 8):
            if batch % cand == 0:
                best = cand
                break
    return best if best else batch


def bilinear_pooling(x, wa, ba, wb, bb, wl, bl, *, b_tile=None,
                     compute_dtype=jnp.bfloat16):
    """x: (batch, in_channels, seq_len) -> (batch, 1, out_channels) f32.

    Matches the PyTorch module: Conv1d(k=1) x2, softmax over seq, bmm with the
    permuted attention maps, mean over c_n, Linear, unsqueeze(1).
    x and the conv weights are cast to `compute_dtype` (bf16 by default) for
    the MXU with f32 accumulation; pass x already in bf16 upstream to realize
    the 2x HBM saving without an extra convert pass.
    """
    batch, in_ch, seq = x.shape
    c_m = wa.shape[0]
    c_n = wb.shape[0]
    out_ch = wl.shape[0]

    x_c = x.astype(compute_dtype)                      # no-op if already bf16
    if b_tile is None:
        b_tile = _pick_b_tile(batch, in_ch, seq, x_c.dtype.itemsize)
    assert batch % b_tile == 0, (batch, b_tile)

    # One-time relayouts of the tiny weights so the kernel body needs no
    # weight-side transposes; the 1/c_n of the trailing mean is folded into Wl.
    wa_t = wa.T.astype(compute_dtype)                  # (C, c_m)
    ba_row = ba.reshape(1, c_m).astype(jnp.float32)
    wb_t = wb.T.astype(compute_dtype)                  # (C, c_n)
    bb_row = bb.reshape(1, c_n).astype(jnp.float32)
    wl_t = (wl.T * (1.0 / c_n)).astype(jnp.float32)    # (c_m, out_ch)
    bl_row = bl.reshape(1, out_ch).astype(jnp.float32)

    kernel = functools.partial(_bilinear_pooling_kernel, b_tile=b_tile,
                               in_ch=in_ch, seq=seq, c_m=c_m, c_n=c_n)

    grid = (batch // b_tile,)
    full2 = lambda i: (0, 0)

    out2d = pl.pallas_call(
        kernel,
        out_shape=jax.ShapeDtypeStruct((batch, out_ch), jnp.float32),
        grid_spec=pltpu.PrefetchScalarGridSpec(
            num_scalar_prefetch=0,
            grid=grid,
            in_specs=[
                pl.BlockSpec((b_tile, in_ch, seq), lambda i: (i, 0, 0)),  # x (native)
                pl.BlockSpec((in_ch, c_m), full2),                        # Wa^T
                pl.BlockSpec((1, c_m), full2),                            # ba
                pl.BlockSpec((in_ch, c_n), full2),                        # Wb^T
                pl.BlockSpec((1, c_n), full2),                            # bb
                pl.BlockSpec((c_m, out_ch), full2),                       # Wl^T / c_n
                pl.BlockSpec((1, out_ch), full2),                         # bl
            ],
            out_specs=pl.BlockSpec((b_tile, out_ch), lambda i: (i, 0)),
        ),
        compiler_params=pltpu.CompilerParams(
            dimension_semantics=("parallel",),
            # Safe on every generation (<= v7x scoped ceiling, > v5e default),
            # with headroom over the ~20 MiB tile-selection budget.
            vmem_limit_bytes=32 * 1024 * 1024,
        ),
    )(x_c, wa_t, ba_row, wb_t, bb_row, wl_t, bl_row)

    return out2d[:, None, :]   # matches PyTorch `.unsqueeze(1)`


def reference(x, wa, ba, wb, bb, wl, bl):
    """Pure-JAX f32 reference mirroring the PyTorch forward exactly."""
    a = jnp.einsum('mc,bcl->bml', wa, x) + ba[None, :, None]
    b = jnp.einsum('nc,bcl->bnl', wb, x) + bb[None, :, None]
    att = jax.nn.softmax(b, axis=-1)
    gd = jnp.einsum('bml,bnl->bmn', a, att)
    g = jnp.mean(gd, axis=-1)
    out = g @ wl.T + bl
    return out[:, None, :]


if __name__ == "__main__":
    # Small shapes consistent with the module's forward contract.
    # batch=16 fits the VMEM budget comfortably -> a single grid step.
    batch, in_channels, seq_len = 16, 4, 16
    c_m, c_n, out_channels = 8, 4, 6

    key = jax.random.PRNGKey(0)
    kx, ka, kab, kb, kbb, kl, klb = jax.random.split(key, 7)

    x = jax.random.normal(kx, (batch, in_channels, seq_len), dtype=jnp.float32)

    # Deterministic, PyTorch-default-style uniform init (synthetic weights).
    def uinit(k, shape, fan_in):
        bound = 1.0 / jnp.sqrt(jnp.float32(fan_in))
        return jax.random.uniform(k, shape, jnp.float32, -bound, bound)

    wa = uinit(ka, (c_m, in_channels), in_channels)      # Conv1d k=1 weight (c_m, C)
    ba = uinit(kab, (c_m,), in_channels)
    wb = uinit(kb, (c_n, in_channels), in_channels)      # (c_n, C)
    bb = uinit(kbb, (c_n,), in_channels)
    wl = uinit(kl, (out_channels, c_m), c_m)             # Linear weight (out, c_m)
    bl = uinit(klb, (out_channels,), c_m)

    out = bilinear_pooling(x, wa, ba, wb, bb, wl, bl)
    out = jax.block_until_ready(out)

    ref = reference(x, wa, ba, wb, bb, wl, bl)
    assert out.shape == (batch, 1, out_channels), out.shape
    # Tolerance covers bf16 MXU inputs (f32 accumulation) and the approximate
    # EUP reciprocal (~2^-14 rel) on the softmax denominator.
    assert jnp.allclose(out, ref, atol=5e-2, rtol=5e-2), (
        float(jnp.max(jnp.abs(out - ref))))

    print("KERNEL_OK")
</pallas_src>

<mosaic_0001>
module attributes {stable_mosaic.version = 11 : i64} {
  func.func @_bilinear_pooling_kernel(%arg0: i32, %arg1: memref<16x4x16xbf16, #tpu.memory_space<vmem>>, %arg2: memref<4x8xbf16, #tpu.memory_space<vmem>>, %arg3: memref<1x8xf32, #tpu.memory_space<vmem>>, %arg4: memref<4x4xbf16, #tpu.memory_space<vmem>>, %arg5: memref<1x4xf32, #tpu.memory_space<vmem>>, %arg6: memref<8x6xf32, #tpu.memory_space<vmem>>, %arg7: memref<1x6xf32, #tpu.memory_space<vmem>>, %arg8: memref<16x6xf32, #tpu.memory_space<vmem>>) attributes {dimension_semantics = [#tpu.dimension_semantics<parallel>], iteration_bounds = array<i64: 1>, scalar_prefetch = 0 : i64, scratch_operands = 0 : i64, tpu.core_type = #tpu.core_type<tc>, window_params = [{transform_indices = @transform_0, window_bounds = array<i64: 16, 4, 16>}, {pipeline_mode = #tpu.pipeline_mode<synchronous>, transform_indices = @transform_1, window_bounds = array<i64: 4, 8>}, {pipeline_mode = #tpu.pipeline_mode<synchronous>, transform_indices = @transform_2, window_bounds = array<i64: 1, 8>}, {pipeline_mode = #tpu.pipeline_mode<synchronous>, transform_indices = @transform_3, window_bounds = array<i64: 4, 4>}, {pipeline_mode = #tpu.pipeline_mode<synchronous>, transform_indices = @transform_4, window_bounds = array<i64: 1, 4>}, {pipeline_mode = #tpu.pipeline_mode<synchronous>, transform_indices = @transform_5, window_bounds = array<i64: 8, 6>}, {pipeline_mode = #tpu.pipeline_mode<synchronous>, transform_indices = @transform_6, window_bounds = array<i64: 1, 6>}, {transform_indices = @transform_7, window_bounds = array<i64: 16, 6>}]} {
    %c0 = arith.constant 0 : index
    %c0_0 = arith.constant 0 : index
    %c0_1 = arith.constant 0 : index
    %0 = vector.load %arg1[%c0, %c0_0, %c0_1] : memref<16x4x16xbf16, #tpu.memory_space<vmem>>, vector<16x4x16xbf16>
    %1 = tpu.transpose %0, [0, 2, 1] : vector<16x4x16xbf16> -> vector<16x16x4xbf16>
    %2 = vector.shape_cast %1 : vector<16x16x4xbf16> to vector<256x4xbf16>
    %c0_2 = arith.constant 0 : index
    %c0_3 = arith.constant 0 : index
    %3 = vector.load %arg2[%c0_2, %c0_3] : memref<4x8xbf16, #tpu.memory_space<vmem>>, vector<4x8xbf16>
    %cst = arith.constant dense<0.000000e+00> : vector<256x8xf32>
    %4 = tpu.matmul %2, %3, %cst {dimension_numbers = #tpu.dot_dimension_numbers<[1], [0], [0], [1], [0, 0, 1, 1], [], []>} : vector<256x4xbf16>, vector<4x8xbf16>, vector<256x8xf32> -> vector<256x8xf32>
    %c0_4 = arith.constant 0 : index
    %c0_5 = arith.constant 0 : index
    %5 = vector.load %arg3[%c0_4, %c0_5] : memref<1x8xf32, #tpu.memory_space<vmem>>, vector<1x8xf32>
    %6 = vector.broadcast %5 : vector<1x8xf32> to vector<256x8xf32>
    %7 = arith.addf %4, %6 : vector<256x8xf32>
    %c0_6 = arith.constant 0 : index
    %c0_7 = arith.constant 0 : index
    %8 = vector.load %arg4[%c0_6, %c0_7] : memref<4x4xbf16, #tpu.memory_space<vmem>>, vector<4x4xbf16>
    %cst_8 = arith.constant dense<0.000000e+00> : vector<256x4xf32>
    %9 = tpu.matmul %2, %8, %cst_8 {dimension_numbers = #tpu.dot_dimension_numbers<[1], [0], [0], [1], [0, 0, 1, 1], [], []>} : vector<256x4xbf16>, vector<4x4xbf16>, vector<256x4xf32> -> vector<256x4xf32>
    %c0_9 = arith.constant 0 : index
    %c0_10 = arith.constant 0 : index
    %10 = vector.load %arg5[%c0_9, %c0_10] : memref<1x4xf32, #tpu.memory_space<vmem>>, vector<1x4xf32>
    %11 = vector.broadcast %10 : vector<1x4xf32> to vector<256x4xf32>
    %12 = arith.addf %9, %11 : vector<256x4xf32>
    %13 = vector.shape_cast %7 : vector<256x8xf32> to vector<16x16x8xf32>
    %14 = vector.shape_cast %12 : vector<256x4xf32> to vector<16x16x4xf32>
    %cst_11 = arith.constant dense<0xFF800000> : vector<16x4xf32>
    %15 = vector.multi_reduction <maximumf>, %14, %cst_11 [1] : vector<16x16x4xf32> to vector<16x4xf32>
    %16 = vector.shape_cast %15 : vector<16x4xf32> to vector<16x1x4xf32>
    %17 = vector.broadcast %16 : vector<16x1x4xf32> to vector<16x16x4xf32>
    %18 = arith.subf %14, %17 : vector<16x16x4xf32>
    %19 = math.exp %18 : vector<16x16x4xf32>
    %cst_12 = arith.constant dense<0.000000e+00> : vector<16x4xf32>
    %20 = vector.multi_reduction <add>, %19, %cst_12 [1] : vector<16x16x4xf32> to vector<16x4xf32>
    %21 = vector.shape_cast %20 : vector<16x4xf32> to vector<16x1x4xf32>
    %22 = tpu.reciprocal %21 {approx = true} : vector<16x1x4xf32> -> vector<16x1x4xf32>
    %23 = vector.broadcast %22 : vector<16x1x4xf32> to vector<16x16x4xf32>
    %24 = arith.mulf %19, %23 : vector<16x16x4xf32>
    %cst_13 = arith.constant dense<0.000000e+00> : vector<16x16xf32>
    %25 = vector.multi_reduction <add>, %24, %cst_13 [2] : vector<16x16x4xf32> to vector<16x16xf32>
    %26 = vector.shape_cast %25 : vector<16x16xf32> to vector<16x16x1xf32>
    %27 = vector.broadcast %26 : vector<16x16x1xf32> to vector<16x16x8xf32>
    %28 = arith.mulf %13, %27 : vector<16x16x8xf32>
    %cst_14 = arith.constant dense<0.000000e+00> : vector<16x8xf32>
    %29 = vector.multi_reduction <add>, %28, %cst_14 [1] : vector<16x16x8xf32> to vector<16x8xf32>
    %c0_15 = arith.constant 0 : index
    %c0_16 = arith.constant 0 : index
    %30 = vector.load %arg6[%c0_15, %c0_16] : memref<8x6xf32, #tpu.memory_space<vmem>>, vector<8x6xf32>
    %cst_17 = arith.constant dense<0.000000e+00> : vector<16x6xf32>
    %31 = tpu.matmul %29, %30, %cst_17 {dimension_numbers = #tpu.dot_dimension_numbers<[1], [0], [0], [1], [0, 0, 1, 1], [], []>} : vector<16x8xf32>, vector<8x6xf32>, vector<16x6xf32> -> vector<16x6xf32>
    %c0_18 = arith.constant 0 : index
    %c0_19 = arith.constant 0 : index
    %32 = vector.load %arg7[%c0_18, %c0_19] : memref<1x6xf32, #tpu.memory_space<vmem>>, vector<1x6xf32>
    %33 = vector.broadcast %32 : vector<1x6xf32> to vector<16x6xf32>
    %34 = arith.addf %31, %33 : vector<16x6xf32>
    %c0_20 = arith.constant 0 : index
    %c0_21 = arith.constant 0 : index
    %35 = vector.load %arg8[%c0_20, %c0_21] : memref<16x6xf32, #tpu.memory_space<vmem>>, vector<16x6xf32>
    tpu.vector_store %arg8[%c0_20, %c0_21], %34 {strides = array<i32>} : memref<16x6xf32, #tpu.memory_space<vmem>>, vector<16x6xf32>,
    return
  }
  func.func @transform_0(%arg0: i32) -> (i32, i32, i32) {
    %c0_i32 = arith.constant 0 : i32
    %c0_i32_0 = arith.constant 0 : i32
    %c0_i32_1 = arith.constant 0 : i32
    return %arg0, %c0_i32, %c0_i32_0 : i32, i32, i32
  }
  func.func @transform_1(%arg0: i32) -> (i32, i32) {
    %c0_i32 = arith.constant 0 : i32
    %c0_i32_0 = arith.constant 0 : i32
    %c0_i32_1 = arith.constant 0 : i32
    return %c0_i32, %c0_i32_0 : i32, i32
  }
  func.func @transform_2(%arg0: i32) -> (i32, i32) {
    %c0_i32 = arith.constant 0 : i32
    %c0_i32_0 = arith.constant 0 : i32
    %c0_i32_1 = arith.constant 0 : i32
    return %c0_i32, %c0_i32_0 : i32, i32
  }
  func.func @transform_3(%arg0: i32) -> (i32, i32) {
    %c0_i32 = arith.constant 0 : i32
    %c0_i32_0 = arith.constant 0 : i32
    %c0_i32_1 = arith.constant 0 : i32
    return %c0_i32, %c0_i32_0 : i32, i32
  }
  func.func @transform_4(%arg0: i32) -> (i32, i32) {
    %c0_i32 = arith.constant 0 : i32
    %c0_i32_0 = arith.constant 0 : i32
    %c0_i32_1 = arith.constant 0 : i32
    return %c0_i32, %c0_i32_0 : i32, i32
  }
  func.func @transform_5(%arg0: i32) -> (i32, i32) {
    %c0_i32 = arith.constant 0 : i32
    %c0_i32_0 = arith.constant 0 : i32
    %c0_i32_1 = arith.constant 0 : i32
    return %c0_i32, %c0_i32_0 : i32, i32
  }
  func.func @transform_6(%arg0: i32) -> (i32, i32) {
    %c0_i32 = arith.constant 0 : i32
    %c0_i32_0 = arith.constant 0 : i32
    %c0_i32_1 = arith.constant 0 : i32
    return %c0_i32, %c0_i32_0 : i32, i32
  }
  func.func @transform_7(%arg0: i32) -> (i32, i32) {
    %c0_i32 = arith.constant 0 : i32
    %c0_i32_0 = arith.constant 0 : i32
    return %arg0, %c0_i32 : i32, i32
  }
}

</mosaic_0001>

<bundles_post_ra>
// kernel: tpu_custom_call.1
= control target key start
LH: loop header
LB: loop body
LE: loop exit
PB: predicated region body
PF: predicated region fallthrough
CT: control target
= control target key end

     0   :  { %12 = vsyncpa [#allocation3], 0  ;;  %s1817_s24 = smov [#allocation2]   ;;  %s2610_s0 = inlined_call_operand.hbm [shape: bf16[16,4,16], index: 0, kind: input, shape index: {}]   ;;  %s2611_s1 = inlined_call_operand.vmem [shape: bf16[4,8], index: 1, kind: input, shape index: {}]   ;;  %s2612_s2 = inlined_call_operand.vmem [shape: f32[1,8], index: 2, kind: input, shape index: {}]   ;;  %s2613_s3 = inlined_call_operand.vmem [shape: bf16[4,4], index: 3, kind: input, shape index: {}]   ;;  %s2614_s4 = inlined_call_operand.vmem [shape: f32[1,4], index: 4, kind: input, shape index: {}]   ;;  %s2615_s5 = inlined_call_operand.vmem [shape: f32[8,6], index: 5, kind: input, shape index: {}]   ;;  %s2616_s6 = inlined_call_operand.vmem [shape: f32[1,6], index: 6, kind: input, shape index: {}]   ;;  %s2617_s7 = inlined_call_operand.vmem [shape: f32[16,6], index: 7, kind: output, shape index: {}]  }
   0x1   :  { %s18_s25 = sshll.u32 %s1817_s24, 4  ;;  %s1793_s28 = scalar_lea.hbm %s2610_s0, 512  ;;  %s19_s25 = int_to_ptr.vmem [resolvable:$true] %s18_s25 }
   0x2   :  { %p1794_p0 = scmp.ne.s32.totalorder %s2610_s0, %s1793_s28  ;;  %p1797_p1 = scmp.lt.u32.totalorder %s1793_s28, %s2610_s0 }
   0x4   :  { %p1799_p2 = pnand %p1797_p1, %p1794_p0 }
   0x6   :  { %1802 = shalt.err (!%p1799_p2)
}
   0x7   :  { %s1803_s10 = scalar_lea.vmem %s19_s25, 512  ;;  %p1808_p4 = scmp.lt.s32.totalorder %s19_s25, %s19_s25 }
   0x8   :  { %p1804_p3 = scmp.ne.s32.totalorder %s19_s25, %s1803_s10  ;;  %p1809_p5 = scmp.lt.s32.totalorder %s1803_s10, %s1803_s10 }
   0xa   :  { %p1810_p6 = por %p1809_p5, %p1808_p4 }
   0xc   :  { %p1811_p7 = pnand %p1810_p6, %p1804_p3 }
   0xe   :  { %1814 = shalt.err (!%p1811_p7)
}
   0xf   :  { %s1818_s11 = smov 32   ;;  %s1819_s12 = smov 2  }
  0x10   :  { %24 = dma.hbm_to_vmem [thread:$0]  %s2610_s0, 512, %s19_s25, [#allocation3], %s1818_s11, %s1818_s11, %s1819_s12  }
  0x11   :  { %1815 = dma.done.wait [#allocation3], 512  }
  0x12   :  { %1816 = vsyncadd [#allocation3], 4294966784  ;;  %v41_v0 = vld [vmem:[#allocation2] sm:$0x3]  ;;  %v43_v1 = vld [vmem:[#allocation2 + $0x4] sm:$0x3] }
  0x13   :  { %57 = vxpose.xlu0.c.b16.start.end [1/1] (short) (narrow) %v41_v0, 16  ;;  %89 = vxpose.xlu1.c.b16.start.end [1/1] (short) (narrow) %v43_v1, 16  ;;  %v42_v2 = vld [vmem:[#allocation2 + $0x2] sm:$0x3]  ;;  %v44_v3 = vld [vmem:[#allocation2 + $0x6] sm:$0x3] }
  0x14   :  { %vm370_vm0 = vcmask 1041408   ;;  %v45_v4 = vld [vmem:[#allocation2 + $0x8] sm:$0x3]  ;;  %v46_v5 = vld [vmem:[#allocation2 + $0xa] sm:$0x3]  ;;  %vm321_vm1 = vcmask 31744  }
  0x15   :  { %v313_v6 = vld [vmem:[%s2611_s1] sm:$0x3]  ;;  %v47_v10 = vld [vmem:[#allocation2 + $0xc] sm:$0x3]  ;;  %v48_v11 = vld [vmem:[#allocation2 + $0xe] sm:$0x3] }
  0x16   :  { %v535_v7 = vld [vmem:[%s2613_s3] sm:$0x3]  ;;  %1691 = vmatprep.subr.msk.bf16.mxu0 %vm370_vm0, %v313_v6  ;;  %v372_v8 = vsel %vm370_vm0, %v313_v6, 0  ;;  %v49_v12 = vld [vmem:[#allocation2 + $0x10] sm:$0x3]  ;;  %vm1267_vm2 = vcmask 64512  }
  0x17   :  { %73 = vxpose.xlu0.c.b16.start.end [1/1] (short) (narrow) %v42_v2, 16  ;;  %105 = vxpose.xlu1.c.b16.start.end [1/1] (short) (narrow) %v44_v3, 16  ;;  %v544_v9 = vsel %vm370_vm0, %v535_v7, 0  ;;  %v50_v13 = vld [vmem:[#allocation2 + $0x12] sm:$0x3]  ;;  %vm1436_vm3 = vcmask 1041409  }
  0x18   :  { %1692 = vmatprep.subr.msk.bf16.mxu1 %vm370_vm0, %v535_v7  ;;  %1619 = vmatpush3.bf16.msra.mxu0 %v372_v8  ;;  %v51_v14 = vld [vmem:[#allocation2 + $0x14] sm:$0x3]  ;;  %v52_v15 = vld [vmem:[#allocation2 + $0x16] sm:$0x3]  ;;  %v53_v16 = vld [vmem:[#allocation2 + $0x18] sm:$0x3] }
  0x19   :  { %1653 = vmatpush3.bf16.msra.mxu1 %v544_v9  ;;  %v54_v17 = vld [vmem:[#allocation2 + $0x1a] sm:$0x3]  ;;  %v55_v18 = vld [vmem:[#allocation2 + $0x1c] sm:$0x3]  ;;  %v56_v19 = vld [vmem:[#allocation2 + $0x1e] sm:$0x3] }
  0x1a   :  { %v1913_v36 = vld [vmem:[%s2614_s4] ss:$0 sm:$0xff]  ;;  %vm1438_vm4 = vcmask 1042434   ;;  %vm1440_vm5 = vcmask 1043459   ;;  %vm1442_vm6 = vcmask 1044484   ;;  %vm1444_vm7 = vcmask 1045509  }
  0x1b   :  { %121 = vxpose.xlu0.c.b16.start.end [1/1] (short) (narrow) %v45_v4, 16  ;;  %137 = vxpose.xlu1.c.b16.start.end [1/1] (short) (narrow) %v46_v5, 16  ;;  %vm1446_vm8 = vcmask 1046534   ;;  %vm1448_vm9 = vcmask 1047559   ;;  %vm1536_vm10 = vcmask 48128  }
  0x1f   :  { %153 = vxpose.xlu0.c.b16.start.end [1/1] (short) (narrow) %v47_v10, 16  ;;  %169 = vxpose.xlu1.c.b16.start.end [1/1] (short) (narrow) %v48_v11, 16 }
  0x23   :  { %185 = vxpose.xlu0.c.b16.start.end [1/1] (short) (narrow) %v49_v12, 16  ;;  %201 = vxpose.xlu1.c.b16.start.end [1/1] (short) (narrow) %v50_v13, 16 }
  0x27   :  { %217 = vxpose.xlu0.c.b16.start.end [1/1] (short) (narrow) %v51_v14, 16  ;;  %233 = vxpose.xlu1.c.b16.start.end [1/1] (short) (narrow) %v52_v15, 16 }
  0x2b   :  { %249 = vxpose.xlu0.c.b16.start.end [1/1] (short) (narrow) %v53_v16, 16  ;;  %265 = vxpose.xlu1.c.b16.start.end [1/1] (short) (narrow) %v54_v17, 16 }
  0x2f   :  { %281 = vxpose.xlu0.c.b16.start.end [1/1] (short) (narrow) %v55_v18, 16  ;;  %297 = vxpose.xlu1.c.b16.start.end [1/1] (short) (narrow) %v56_v19, 16 }
  0x79   :  { %v65_v20 = vpop.trf.xlu0  ;;  %v97_v21 = vpop.trf.xlu1 }
  0x7a   :  { %1620 = vmatprep.mubr.msk.bf16.mxu0 %vm321_vm1, %v65_v20  ;;  %1654 = vmatprep.mubr.msk.bf16.mxu1 %vm321_vm1, %v65_v20 }
  0x7d   :  { %v81_v22 = vpop.trf.xlu0  ;;  %v113_v23 = vpop.trf.xlu1 }
  0x7e   :  { %1621 = vmatmul.mubr.msk.bf16.vlgmr.msra.gmra.mrb[0].mxu0 %vm321_vm1, %v81_v22  ;;  %1655 = vmatmul.mubr.msk.bf16.vlgmr.msra.gmra.mrb[0].mxu1 %vm321_vm1, %v81_v22 }
  0x7f   :  { %1624 = vmatprep.mubr.msk.bf16.mxu0 %vm321_vm1, %v97_v21  ;;  %1658 = vmatprep.mubr.msk.bf16.mxu1 %vm321_vm1, %v97_v21 }
  0x81   :  { %v129_v24 = vpop.trf.xlu0  ;;  %v145_v25 = vpop.trf.xlu1 }
  0x85   :  { %v161_v26 = vpop.trf.xlu0  ;;  %v177_v27 = vpop.trf.xlu1 }
  0x86   :  { %1625 = vmatmul.mubr.msk.bf16.gmra.mrb[4].mxu0 %vm321_vm1, %v113_v23  ;;  %1659 = vmatmul.mubr.msk.bf16.gmra.mrb[4].mxu1 %vm321_vm1, %v113_v23 }
  0x87   :  { %1628 = vmatprep.mubr.msk.bf16.mxu0 %vm321_vm1, %v129_v24  ;;  %1662 = vmatprep.mubr.msk.bf16.mxu1 %vm321_vm1, %v129_v24 }
  0x89   :  { %v193_v28 = vpop.trf.xlu0  ;;  %v209_v29 = vpop.trf.xlu1 }
  0x8d   :  { %v225_v30 = vpop.trf.xlu0  ;;  %v241_v31 = vpop.trf.xlu1 }
  0x8e   :  { %1629 = vmatmul.mubr.msk.bf16.gmra.mrb[8].mxu0 %vm321_vm1, %v145_v25  ;;  %1663 = vmatmul.mubr.msk.bf16.gmra.mrb[8].mxu1 %vm321_vm1, %v145_v25 }
  0x8f   :  { %1632 = vmatprep.mubr.msk.bf16.mxu0 %vm321_vm1, %v161_v26  ;;  %1666 = vmatprep.mubr.msk.bf16.mxu1 %vm321_vm1, %v161_v26 }
  0x91   :  { %v257_v32 = vpop.trf.xlu0  ;;  %v273_v33 = vpop.trf.xlu1 }
  0x95   :  { %v289_v34 = vpop.trf.xlu0  ;;  %v305_v35 = vpop.trf.xlu1 }
  0x96   :  { %1633 = vmatmul.mubr.msk.bf16.gmra.mrb[12].mxu0 %vm321_vm1, %v177_v27  ;;  %1667 = vmatmul.mubr.msk.bf16.gmra.mrb[12].mxu1 %vm321_vm1, %v177_v27 }
  0x97   :  { %1636 = vmatprep.mubr.msk.bf16.mxu0 %vm321_vm1, %v193_v28  ;;  %1670 = vmatprep.mubr.msk.bf16.mxu1 %vm321_vm1, %v193_v28 }
  0x9e   :  { %1637 = vmatmul.mubr.msk.bf16.gmra.mrb[16].mxu0 %vm321_vm1, %v209_v29  ;;  %1671 = vmatmul.mubr.msk.bf16.gmra.mrb[16].mxu1 %vm321_vm1, %v209_v29 }
  0x9f   :  { %1640 = vmatprep.mubr.msk.bf16.mxu0 %vm321_vm1, %v225_v30  ;;  %1674 = vmatprep.mubr.msk.bf16.mxu1 %vm321_vm1, %v225_v30 }
  0xa6   :  { %1641 = vmatmul.mubr.msk.bf16.gmra.mrb[20].mxu0 %vm321_vm1, %v241_v31  ;;  %1675 = vmatmul.mubr.msk.bf16.gmra.mrb[20].mxu1 %vm321_vm1, %v241_v31 }
  0xa7   :  { %1644 = vmatprep.mubr.msk.bf16.mxu0 %vm321_vm1, %v257_v32  ;;  %1678 = vmatprep.mubr.msk.bf16.mxu1 %vm321_vm1, %v257_v32 }
  0xae   :  { %1645 = vmatmul.mubr.msk.bf16.gmra.mrb[24].mxu0 %vm321_vm1, %v273_v33  ;;  %1679 = vmatmul.mubr.msk.bf16.gmra.mrb[24].mxu1 %vm321_vm1, %v273_v33 }
  0xaf   :  { %1648 = vmatprep.mubr.msk.bf16.mxu0 %vm321_vm1, %v289_v34  ;;  %1682 = vmatprep.mubr.msk.bf16.mxu1 %vm321_vm1, %v289_v34 }
  0xb6   :  { %1649 = vmatmul.mubr.msk.bf16.gmra.mrb[28].mxu0 %vm321_vm1, %v305_v35  ;;  %1683 = vmatmul.mubr.msk.bf16.gmra.mrb[28].mxu1 %vm321_vm1, %v305_v35 }
 0x151   :  { %v1915_v37 = vpop.f32.mrb[0].mxu0  ;;  %v1656_v38 = vpop.f32.mrb[0].mxu1 }
 0x152   :  { %v1918_v39 = vadd.f32 %v1656_v38, %v1913_v36  ;;  %v1920_v40 = vpop.f32.mrb[1].mxu0  ;;  %v580_v41 = vpop.f32.mrb[1].mxu1 }
 0x153   :  { %2618 = vst [vmem:[#allocation5_spill] sm:$0xff] %v1920_v40  ;;  %v1923_v42 = vadd.f32 %v1913_v36, %v580_v41  ;;  %v1925_v43 = vpop.f32.mrb[2].mxu0  ;;  %v1657_v44 = vpop.f32.mrb[2].mxu1 }
 0x154   :  { %v592_v45 = vadd.f32 %v1657_v44, %v1913_v36  ;;  %v1928_v46 = vpop.f32.mrb[3].mxu0  ;;  %v583_v47 = vpop.f32.mrb[3].mxu1  ;;  %v716_v49 = vsel %vm321_vm1, %v1918_v39, -inf }
 0x155   :  { %v1931_v48 = vadd.f32 %v1913_v36, %v583_v47  ;;  %v707_v51 = vsel %vm321_vm1, %v1923_v42, -inf }
 0x156   :  { %v717_v50 = vsel %vm321_vm1, %v592_v45, -inf }
 0x157   :  { %v718_v52 = vmax.f32 %v716_v49, %v717_v50  ;;  %v708_v53 = vsel %vm321_vm1, %v1931_v48, -inf }
 0x158   :  { %v709_v54 = vmax.f32 %v707_v51, %v708_v53 }
 0x159   :  { %v719_v55 = vrot.slane %v718_v52, 4  ;;  %v1940_v56 = vpop.f32.mrb[4].mxu0  ;;  %v1660_v57 = vpop.f32.mrb[4].mxu1 }
 0x15a   :  { %2619 = vst [vmem:[#allocation6_spill] sm:$0xff] %v1940_v56  ;;  %v710_v58 = vrot.slane %v709_v54, 4  ;;  %v1943_v59 = vadd.f32 %v1660_v57, %v1913_v36  ;;  %v1945_v60 = vpop.f32.mrb[5].mxu0  ;;  %v596_v61 = vpop.f32.mrb[5].mxu1 }
 0x15b   :  { %2620 = vst [vmem:[#allocation7_spill] sm:$0xff] %v1945_v60  ;;  %v720_v62 = vmax.f32 %v718_v52, %v719_v55  ;;  %v1948_v63 = vadd.f32 %v1913_v36, %v596_v61  ;;  %v1950_v0 = vpop.f32.mrb[6].mxu0  ;;  %v1661_v1 = vpop.f32.mrb[6].mxu1 }
 0x15c   :  { %2621 = vst [vmem:[#allocation8_spill] sm:$0xff] %v1950_v0  ;;  %v711_v2 = vmax.f32 %v709_v54, %v710_v58  ;;  %v1953_v3 = vadd.f32 %v1661_v1, %v1913_v36  ;;  %v1955_v4 = vpop.f32.mrb[7].mxu0  ;;  %v599_v5 = vpop.f32.mrb[7].mxu1  ;;  %v734_v9 = vsel %vm321_vm1, %v1943_v59, -inf }
 0x15d   :  { %2622 = vst [vmem:[#allocation9_spill] sm:$0xff] %v1955_v4  ;;  %v721_v6 = vrot.slane %v720_v62, 2  ;;  %v1958_v7 = vadd.f32 %v1913_v36, %v599_v5  ;;  %v725_v12 = vsel %vm321_vm1, %v1948_v63, -inf }
 0x15e   :  { %v712_v8 = vrot.slane %v711_v2, 2  ;;  %v735_v10 = vsel %vm321_vm1, %v1953_v3, -inf }
 0x15f   :  { %v722_v11 = vmax.f32 %v720_v62, %v721_v6  ;;  %v736_v13 = vmax.f32 %v734_v9, %v735_v10  ;;  %v726_v14 = vsel %vm321_vm1, %v1958_v7, -inf }
 0x160   :  { %v713_v15 = vmax.f32 %v711_v2, %v712_v8  ;;  %v727_v16 = vmax.f32 %v725_v12, %v726_v14 }
 0x161   :  { %v723_v17 = vrot.slane %v722_v11, 1  ;;  %v737_v18 = vrot.slane %v736_v13, 4  ;;  %v1968_v19 = vpop.f32.mrb[8].mxu0  ;;  %v1664_v20 = vpop.f32.mrb[8].mxu1 }
 0x162   :  { %2623 = vst [vmem:[#allocation10_spill] sm:$0xff] %v1968_v19  ;;  %v714_v21 = vrot.slane %v713_v15, 1  ;;  %v728_v22 = vrot.slane %v727_v16, 4  ;;  %v1970_v23 = vpop.f32.mrb[9].mxu0  ;;  %v612_v24 = vpop.f32.mrb[9].mxu1  ;;  %v1973_v27 = vadd.f32 %v1664_v20, %v1913_v36 }
 0x163   :  { %2624 = vst [vmem:[#allocation11_spill] sm:$0xff] %v1970_v23  ;;  %v724_v25 = vmax.f32 %v722_v11, %v723_v17  ;;  %v738_v26 = vmax.f32 %v736_v13, %v737_v18  ;;  %v1975_v28 = vpop.f32.mrb[10].mxu0  ;;  %v1665_v29 = vpop.f32.mrb[10].mxu1  ;;  %v1981_v41 = vadd.f32 %v1913_v36, %v612_v24 }
 0x164   :  { %2625 = vst [vmem:[#allocation12_spill] sm:$0xff] %v1975_v28  ;;  %v715_v30 = vmax.f32 %v713_v15, %v714_v21  ;;  %v729_v31 = vmax.f32 %v727_v16, %v728_v22  ;;  %v1977_v32 = vpop.f32.mrb[11].mxu0  ;;  %v615_v33 = vpop.f32.mrb[11].mxu1  ;;  %v1986_v50 = vadd.f32 %v1665_v29, %v1913_v36  ;;  %v752_v54 = vsel %vm321_vm1, %v1973_v27, -inf }
 0x165   :  { %2626 = vst [vmem:[#allocation13_spill] sm:$0xff] %v1977_v32  ;;  %v853_v34 = vsub.f32 %v1918_v39, %v724_v25  ;;  %v854_v35 = vsub.f32 %v592_v45, %v724_v25  ;;  %v739_v38 = vrot.slane %v738_v26, 2  ;;  %v743_v2 = vsel %vm321_vm1, %v1981_v41, -inf }
 0x166   :  { %v851_v44 = vsub.f32 %v1923_v42, %v715_v30  ;;  %v852_v47 = vsub.f32 %v1931_v48, %v715_v30  ;;  %v730_v49 = vrot.slane %v729_v31, 2  ;;  %v753_v57 = vsel %vm321_vm1, %v1986_v50, -inf }
 0x167   :  { %v887_v51 = vmul.f32 1.442695, %v853_v34  ;;  %v889_v52 = vmul.f32 1.442695, %v854_v35  ;;  %v740_v53 = vmax.f32 %v738_v26, %v739_v38  ;;  %v754_v58 = vmax.f32 %v752_v54, %v753_v57 }
 0x168   :  { %v883_v39 = vmul.f32 1.442695, %v851_v44  ;;  %v885_v45 = vmul.f32 1.442695, %v852_v47  ;;  %v731_v55 = vmax.f32 %v729_v31, %v730_v49  ;;  %v1993_v48 = vadd.f32 %v1913_v36, %v615_v33 }
 0x169   :  { %1697 = vpow2.f32 %v887_v51  ;;  %v741_v42 = vrot.slane %v740_v53, 1  ;;  %v1995_v61 = vpop.f32.mrb[12].mxu0  ;;  %v1668_v62 = vpop.f32.mrb[12].mxu1  ;;  %v755_v9 = vrot.slane %v754_v58, 4 }
 0x16a   :  { %2627 = vst [vmem:[#allocation14_spill] sm:$0xff] %v1995_v61  ;;  %1699 = vpow2.f32 %v889_v52  ;;  %v732_v1 = vrot.slane %v731_v55, 1  ;;  %v1999_v5 = vpop.f32.mrb[13].mxu0  ;;  %v628_v6 = vpop.f32.mrb[13].mxu1  ;;  %v744_v10 = vsel %vm321_vm1, %v1993_v48, -inf  ;;  %v2012_v30 = vadd.f32 %v1668_v62, %v1913_v36 }
 0x16b   :  { %2628 = vst [vmem:[#allocation15_spill] sm:$0xff] %v1999_v5  ;;  %1701 = vpow2.f32 %v883_v39  ;;  %v742_v8 = vmax.f32 %v740_v53, %v741_v42  ;;  %v2003_v11 = vpop.f32.mrb[14].mxu0  ;;  %v1669_v12 = vpop.f32.mrb[14].mxu1  ;;  %v745_v14 = vmax.f32 %v743_v2, %v744_v10  ;;  %v756_v20 = vmax.f32 %v754_v58, %v755_v9 }
 0x16c   :  { %2629 = vst [vmem:[#allocation16_spill] sm:$0xff] %v2003_v11  ;;  %1703 = vpow2.f32 %v885_v45  ;;  %v733_v13 = vmax.f32 %v731_v55, %v732_v1  ;;  %v2005_v15 = vpop.f32.mrb[15].mxu0  ;;  %v631_v16 = vpop.f32.mrb[15].mxu1  ;;  %v770_v53 = vsel %vm321_vm1, %v2012_v30, -inf }
 0x16d   :  { %2630 = vst [vmem:[#allocation17_spill] sm:$0xff] %v2005_v15  ;;  %v857_v17 = vsub.f32 %v1943_v59, %v742_v8  ;;  %v858_v18 = vsub.f32 %v1953_v3, %v742_v8  ;;  %v746_v24 = vrot.slane %v745_v14, 4  ;;  %v757_v29 = vrot.slane %v756_v20, 2 }
 0x16e   :  { %v855_v21 = vsub.f32 %v1948_v63, %v733_v13  ;;  %v856_v22 = vsub.f32 %v1958_v7, %v733_v13  ;;  %v2015_v59 = vadd.f32 %v1913_v36, %v628_v6  ;;  %v2018_v3 = vadd.f32 %v1669_v12, %v1913_v36 }
 0x16f   :  { %v895_v25 = vmul.f32 1.442695, %v857_v17  ;;  %v897_v26 = vmul.f32 1.442695, %v858_v18  ;;  %v747_v34 = vmax.f32 %v745_v14, %v746_v24  ;;  %v758_v35 = vmax.f32 %v756_v20, %v757_v29 }
 0x170   :  { %v891_v31 = vmul.f32 1.442695, %v855_v21  ;;  %v893_v33 = vmul.f32 1.442695, %v856_v22  ;;  %v2025_v44 = vadd.f32 %v1913_v36, %v631_v16  ;;  %v771_v54 = vsel %vm321_vm1, %v2018_v3, -inf }
 0x171   :  { %1705 = vpow2.f32 %v895_v25  ;;  %v2020_v63 = vpop.f32.mrb[16].mxu0  ;;  %v2022_v7 = vpop.f32.mrb[16].mxu1  ;;  %v748_v38 = vrot.slane %v747_v34, 2  ;;  %v759_v52 = vrot.slane %v758_v35, 1  ;;  %v772_v58 = vmax.f32 %v770_v53, %v771_v54 }
 0x172   :  { %2631 = vst [vmem:[#allocation18_spill] sm:$0xff] %v2020_v63  ;;  %1707 = vpow2.f32 %v897_v26  ;;  %v2027_v47 = vpop.f32.mrb[17].mxu0  ;;  %v2029_v49 = vpop.f32.mrb[17].mxu1  ;;  %v761_v9 = vsel %vm321_vm1, %v2015_v59, -inf  ;;  %v762_v10 = vsel %vm321_vm1, %v2025_v44, -inf }
 0x173   :  { %2632 = vst [vmem:[#allocation19_spill] sm:$0xff] %v2027_v47  ;;  %v2031_v51 = vpop.eup %1697  ;;  %1709 = vpow2.f32 %v891_v31  ;;  %v2037_v39 = vpop.f32.mrb[18].mxu0  ;;  %v749_v42 = vmax.f32 %v747_v34, %v748_v38  ;;  %v760_v8 = vmax.f32 %v758_v35, %v759_v52  ;;  %v773_v17 = vrot.slane %v772_v58, 4 }
 0x174   :  { %2633 = vst [vmem:[#allocation20_spill] sm:$0xff] %v2037_v39  ;;  %v1673_v45 = vpop.f32.mrb[18].mxu1  ;;  %v2039_v55 = vpop.eup %1699  ;;  %v956_v57 = vsel %vm321_vm1, %v2031_v51, 0.0  ;;  %1711 = vpow2.f32 %v893_v33  ;;  %v763_v22 = vmax.f32 %v761_v9, %v762_v10 }
 0x175   :  { %v2043_v62 = vpop.f32.mrb[19].mxu0  ;;  %v647_v1 = vpop.f32.mrb[19].mxu1  ;;  %v957_v6 = vsel %vm321_vm1, %v2039_v55, 0.0  ;;  %v750_v16 = vrot.slane %v749_v42, 1  ;;  %v861_v20 = vsub.f32 %v1973_v27, %v760_v8  ;;  %v862_v21 = vsub.f32 %v1986_v50, %v760_v8 }
 0x176   :  { %2634 = vst [vmem:[#allocation21_spill] sm:$0xff] %v2043_v62  ;;  %v2045_v2 = vpop.eup %1701  ;;  %v2055_v13 = vadd.f32 %v957_v6, %v956_v57  ;;  %v774_v26 = vmax.f32 %v772_v58, %v773_v17  ;;  %v764_v33 = vrot.slane %v763_v22, 4 }
 0x177   :  { %v2053_v12 = vpop.eup %1703  ;;  %v947_v14 = vsel %vm321_vm1, %v2045_v2, 0.0  ;;  %v751_v25 = vmax.f32 %v749_v42, %v750_v16  ;;  %v903_v29 = vmul.f32 1.442695, %v861_v20  ;;  %v905_v31 = vmul.f32 1.442695, %v862_v21 }
 0x178   :  { %v948_v18 = vsel %vm321_vm1, %v2053_v12, 0.0  ;;  %v775_v50 = vrot.slane %v774_v26, 2  ;;  %v765_v54 = vmax.f32 %v763_v22, %v764_v33 }
 0x179   :  { %v2063_v24 = vadd.f32 %v948_v18, %v947_v14  ;;  %v2065_v34 = vpop.f32.mrb[20].mxu0  ;;  %v859_v35 = vsub.f32 %v1981_v41, %v751_v25  ;;  %v860_v38 = vsub.f32 %v1993_v48, %v751_v25  ;;  %v2069_v52 = vpop.f32.mrb[20].mxu1  ;;  %1713 = vpow2.f32 %v903_v29 }
 0x17a   :  { %2635 = vst [vmem:[#allocation22_spill] sm:$0xff] %v2065_v34  ;;  %v2071_v53 = vpop.f32.mrb[21].mxu0  ;;  %v2075_v57 = vpop.f32.mrb[21].mxu1  ;;  %1715 = vpow2.f32 %v905_v31  ;;  %v776_v16 = vmax.f32 %v774_v26, %v775_v50  ;;  %v766_v17 = vrot.slane %v765_v54, 2  ;;  %v2101_v25 = vadd.f32 %v2022_v7, %v1913_v36 }
 0x17b   :  { %2636 = vst [vmem:[#allocation23_spill] sm:$0xff] %v2071_v53  ;;  %v2073_v27 = vpop.eup %1705  ;;  %v2077_v42 = vpop.f32.mrb[22].mxu0  ;;  %v899_v48 = vmul.f32 1.442695, %v859_v35  ;;  %v901_v14 = vmul.f32 1.442695, %v860_v38  ;;  %v2109_v35 = vadd.f32 %v1913_v36, %v2029_v49  ;;  %v2112_v38 = vadd.f32 %v1673_v45, %v1913_v36 }
 0x17c   :  { %2637 = vst [vmem:[#allocation24_spill] sm:$0xff] %v2077_v42  ;;  %v2079_v58 = vpop.eup %1707  ;;  %v974_v41 = vsel %vm321_vm1, %v2073_v27, 0.0  ;;  %v2083_v6 = vpop.f32.mrb[22].mxu1  ;;  %v777_v26 = vrot.slane %v776_v16, 1  ;;  %v767_v31 = vmax.f32 %v765_v54, %v766_v17  ;;  %v2115_v7 = vadd.f32 %v1913_v36, %v647_v1 }
 0x17d   :  { %v2085_v8 = vpop.f32.mrb[23].mxu0  ;;  %v2087_v9 = vpop.eup %1709  ;;  %v975_v10 = vsel %vm321_vm1, %v2079_v58, 0.0  ;;  %1717 = vpow2.f32 %v899_v48  ;;  %v788_v54 = vsel %vm321_vm1, %v2101_v25, -inf  ;;  %v950_v39 = vrot.slane %v2063_v24, 4 }
 0x17e   :  { %2638 = vst [vmem:[#allocation25_spill] sm:$0xff] %v2085_v8  ;;  %v2091_v18 = vpop.f32.mrb[23].mxu1  ;;  %v2093_v20 = vpop.eup %1711  ;;  %v2095_v21 = vadd.f32 %v975_v10, %v974_v41  ;;  %v965_v22 = vsel %vm321_vm1, %v2087_v9, 0.0  ;;  %1719 = vpow2.f32 %v901_v14  ;;  %v778_v50 = vmax.f32 %v776_v16, %v777_v26 }
 0x17f   :  { %v966_v29 = vsel %vm321_vm1, %v2093_v20, 0.0  ;;  %v768_v41 = vrot.slane %v767_v31, 1  ;;  %v789_v14 = vsel %vm321_vm1, %v2112_v38, -inf  ;;  %v780_v8 = vsel %vm321_vm1, %v2115_v7, -inf }
 0x180   :  { %v2105_v33 = vadd.f32 %v966_v29, %v965_v22  ;;  %v865_v45 = vsub.f32 %v2012_v30, %v778_v50  ;;  %v866_v16 = vsub.f32 %v2018_v3, %v778_v50  ;;  %v790_v22 = vmax.f32 %v788_v54, %v789_v14 }
 0x181   :  { %v2117_v48 = vpop.f32.mrb[24].mxu0  ;;  %v2119_v10 = vpop.f32.mrb[24].mxu1  ;;  %v769_v1 = vmax.f32 %v767_v31, %v768_v41  ;;  %v959_v54 = vrot.slane %v2055_v13, 4 }
 0x182   :  { %2639 = vst [vmem:[#allocation26_spill] sm:$0xff] %v2117_v48  ;;  %v2125_v49 = vpop.f32.mrb[25].mxu0  ;;  %v2127_v17 = vpop.f32.mrb[25].mxu1  ;;  %v779_v48 = vsel %vm321_vm1, %v2109_v35, -inf  ;;  %v911_v30 = vmul.f32 1.442695, %v865_v45 }
 0x183   :  { %2640 = vst [vmem:[#allocation27_spill] sm:$0xff] %v2125_v49  ;;  %v2131_v29 = vpop.f32.mrb[26].mxu0  ;;  %v2133_v26 = vpop.f32.mrb[26].mxu1  ;;  %v913_v3 = vmul.f32 1.442695, %v866_v16  ;;  %v863_v31 = vsub.f32 %v2015_v59, %v769_v1  ;;  %v864_v50 = vsub.f32 %v2025_v44, %v769_v1  ;;  %v781_v42 = vmax.f32 %v779_v48, %v780_v8 }
 0x184   :  { %2641 = vst [vmem:[#allocation28_spill] sm:$0xff] %v2131_v29  ;;  %v2139_v53 = vpop.f32.mrb[27].mxu0  ;;  %v2141_v49 = vpop.f32.mrb[27].mxu1  ;;  %v791_v29 = vrot.slane %v790_v22, 4  ;;  %1721 = vpow2.f32 %v911_v30  ;;  %v2165_v48 = vadd.f32 %v2069_v52, %v1913_v36  ;;  %v977_v52 = vrot.slane %v2095_v21, 4 }
 0x185   :  { %2642 = vst [vmem:[#allocation29_spill] sm:$0xff] %v2139_v53  ;;  %v2143_v34 = vpop.eup %1713  ;;  %v907_v62 = vmul.f32 1.442695, %v863_v31  ;;  %v909_v45 = vmul.f32 1.442695, %v864_v50  ;;  %1723 = vpow2.f32 %v913_v3  ;;  %v782_v1 = vrot.slane %v781_v42, 4 }
 0x186   :  { %v2147_v41 = vpop.eup %1715  ;;  %v992_v14 = vsel %vm321_vm1, %v2143_v34, 0.0  ;;  %v792_v44 = vmax.f32 %v790_v22, %v791_v29  ;;  %v2175_v29 = vadd.f32 %v1913_v36, %v2075_v57  ;;  %v968_v57 = vrot.slane %v2105_v33, 4 }
 0x187   :  { %v993_v53 = vsel %vm321_vm1, %v2147_v41, 0.0  ;;  %v2154_v16 = vpop.eup %1717  ;;  %1725 = vpow2.f32 %v907_v62 }
 0x188   :  { %v2156_v59 = vadd.f32 %v993_v53, %v992_v14  ;;  %v2158_v47 = vpop.eup %1719  ;;  %v983_v8 = vsel %vm321_vm1, %v2154_v16, 0.0  ;;  %1727 = vpow2.f32 %v909_v45  ;;  %v793_v22 = vrot.slane %v792_v44, 2 }
 0x189   :  { %v2167_v30 = vpop.f32.mrb[28].mxu0  ;;  %v2169_v31 = vpop.f32.mrb[28].mxu1  ;;  %v984_v53 = vsel %vm321_vm1, %v2158_v47, 0.0  ;;  %v783_v14 = vmax.f32 %v781_v42, %v782_v1  ;;  %v2202_v42 = vadd.f32 %v959_v54, %v2055_v13  ;;  %v806_v1 = vsel %vm321_vm1, %v2165_v48, -inf }
 0x18a   :  { %2643 = vst [vmem:[#allocation30_spill] sm:$0xff] %v2167_v30  ;;  %v2177_v3 = vpop.f32.mrb[29].mxu0  ;;  %v2179_v62 = vpop.f32.mrb[29].mxu1  ;;  %v2182_v50 = vadd.f32 %v984_v53, %v983_v8  ;;  %v2186_v30 = vadd.f32 %v2083_v6, %v1913_v36  ;;  %v794_v15 = vmax.f32 %v792_v44, %v793_v22  ;;  %v797_v44 = vsel %vm321_vm1, %v2175_v29, -inf }
 0x18b   :  { %2644 = vst [vmem:[#allocation31_spill] sm:$0xff] %v2177_v3  ;;  %v2188_v63 = vpop.f32.mrb[30].mxu0  ;;  %v2190_v45 = vpop.f32.mrb[30].mxu1  ;;  %v2195_v3 = vadd.f32 %v1913_v36, %v2091_v18  ;;  %v784_v6 = vrot.slane %v783_v14, 2  ;;  %v2216_v13 = vadd.f32 %v977_v52, %v2095_v21  ;;  %v2219_v61 = vadd.f32 %v968_v57, %v2105_v33 }
 0x18c   :  { %2645 = vst [vmem:[#allocation32_spill] sm:$0xff] %v2188_v63  ;;  %v2197_v5 = vpop.f32.mrb[31].mxu0  ;;  %v2199_v8 = vpop.f32.mrb[31].mxu1  ;;  %v807_v53 = vsel %vm321_vm1, %v2186_v30, -inf  ;;  %v795_v63 = vrot.slane %v794_v15, 1  ;;  %v995_v32 = vrot.slane %v2156_v59, 4 }
 0x18d   :  { %2646 = vst [vmem:[#allocation33_spill] sm:$0xff] %v2197_v5  ;;  %v808_v18 = vmax.f32 %v806_v1, %v807_v53  ;;  %v798_v22 = vsel %vm321_vm1, %v2195_v3, -inf  ;;  %v2213_v5 = vadd.f32 %v950_v39, %v2063_v24  ;;  %v785_v54 = vmax.f32 %v783_v14, %v784_v6 }
 0x18e   :  { %v799_v11 = vmax.f32 %v797_v44, %v798_v22  ;;  %v796_v23 = vmax.f32 %v794_v15, %v795_v63  ;;  %v2222_v19 = vpop.eup %1721  ;;  %v986_v1 = vrot.slane %v2182_v50, 4  ;;  %v2227_v39 = vadd.f32 %v2119_v10, %v1913_v36 }
 0x18f   :  { %v809_v28 = vrot.slane %v808_v18, 4  ;;  %v786_v53 = vrot.slane %v785_v54, 1  ;;  %v2229_v24 = vpop.eup %1723  ;;  %v1010_v21 = vsel %vm321_vm1, %v2222_v19, 0.0  ;;  %v2241_v10 = vadd.f32 %v2133_v26, %v1913_v36 }
 0x190   :  { %v800_v60 = vrot.slane %v799_v11, 4  ;;  %v869_v33 = vsub.f32 %v2101_v25, %v796_v23  ;;  %v870_v15 = vsub.f32 %v2112_v38, %v796_v23  ;;  %v1011_v14 = vsel %vm321_vm1, %v2229_v24, 0.0 }
 0x191   :  { %v810_v63 = vmax.f32 %v808_v18, %v809_v28  ;;  %v2235_v52 = vpop.eup %1725  ;;  %v787_v57 = vmax.f32 %v785_v54, %v786_v53  ;;  %v1012_v22 = vadd.f32 %v1011_v14, %v1010_v21  ;;  %v2253_v54 = vadd.f32 %v1913_v36, %v2127_v17 }
 0x192   :  { %v801_v6 = vmax.f32 %v799_v11, %v800_v60  ;;  %v2243_v44 = vpop.eup %1727  ;;  %v1001_v25 = vsel %vm321_vm1, %v2235_v52, 0.0  ;;  %v919_v4 = vmul.f32 1.442695, %v869_v33  ;;  %v921_v23 = vmul.f32 1.442695, %v870_v15 }
 0x193   :  { %v1002_v28 = vsel %vm321_vm1, %v2243_v44, 0.0  ;;  %v867_v38 = vsub.f32 %v2109_v35, %v787_v57  ;;  %v868_v18 = vsub.f32 %v2115_v7, %v787_v57  ;;  %v811_v60 = vrot.slane %v810_v63, 2 }
 0x194   :  { %v1003_v11 = vadd.f32 %v1002_v28, %v1001_v25  ;;  %1729 = vpow2.f32 %v919_v4  ;;  %v802_v26 = vrot.slane %v801_v6, 2  ;;  %v1013_v15 = vrot.slane %v1012_v22, 4 }
 0x195   :  { %1731 = vpow2.f32 %v921_v23  ;;  %v915_v53 = vmul.f32 1.442695, %v867_v38  ;;  %v917_v21 = vmul.f32 1.442695, %v868_v18  ;;  %v812_v33 = vmax.f32 %v810_v63, %v811_v60 }
 0x196   :  { %v803_v14 = vmax.f32 %v801_v6, %v802_v26  ;;  %v824_v56 = vsel %vm321_vm1, %v2227_v39, -inf  ;;  %v825_v35 = vsel %vm321_vm1, %v2241_v10, -inf  ;;  %v2260_v7 = vadd.f32 %v995_v32, %v2156_v59 }
 0x197   :  { %1733 = vpow2.f32 %v915_v53  ;;  %v813_v4 = vrot.slane %v812_v33, 1  ;;  %v826_v57 = vmax.f32 %v824_v56, %v825_v35  ;;  %v1004_v17 = vrot.slane %v1003_v11, 4 }
 0x198   :  { %1735 = vpow2.f32 %v917_v21  ;;  %v804_v25 = vrot.slane %v803_v14, 1  ;;  %v2264_v63 = vadd.f32 %v1913_v36, %v2141_v49  ;;  %v2267_v6 = vadd.f32 %v986_v1, %v2182_v50 }
 0x199   :  { %v814_v23 = vmax.f32 %v812_v33, %v813_v4  ;;  %v815_v28 = vsel %vm321_vm1, %v2253_v54, -inf  ;;  %v827_v38 = vrot.slane %v826_v57, 4  ;;  %v2271_v32 = vadd.f32 %v1013_v15, %v1012_v22 }
 0x19a   :  { %v805_v59 = vmax.f32 %v803_v14, %v804_v25  ;;  %v816_v56 = vsel %vm321_vm1, %v2264_v63, -inf  ;;  %v2277_v18 = vadd.f32 %v2169_v31, %v1913_v36  ;;  %v2281_v26 = vadd.f32 %v1004_v17, %v1003_v11 }
 0x19b   :  { %v873_v49 = vsub.f32 %v2165_v48, %v814_v23  ;;  %v874_v50 = vsub.f32 %v2186_v30, %v814_v23  ;;  %v828_v1 = vmax.f32 %v826_v57, %v827_v38  ;;  %v817_v60 = vmax.f32 %v815_v28, %v816_v56 }
 0x19c   :  { %v871_v53 = vsub.f32 %v2175_v29, %v805_v59  ;;  %v872_v22 = vsub.f32 %v2195_v3, %v805_v59  ;;  %v2287_v21 = vadd.f32 %v1913_v36, %v2179_v62  ;;  %v842_v11 = vsel %vm321_vm1, %v2277_v18, -inf }
 0x19d   :  { %v927_v33 = vmul.f32 1.442695, %v873_v49  ;;  %v929_v15 = vmul.f32 1.442695, %v874_v50  ;;  %v829_v31 = vrot.slane %v828_v1, 2  ;;  %v818_v14 = vrot.slane %v817_v60, 4 }
 0x19e   :  { %v2289_v35 = vpop.eup %1729  ;;  %v923_v48 = vmul.f32 1.442695, %v871_v53  ;;  %v925_v30 = vmul.f32 1.442695, %v872_v22  ;;  %v2295_v29 = vadd.f32 %v2190_v45, %v1913_v36  ;;  %v833_v25 = vsel %vm321_vm1, %v2287_v21, -inf }
 0x19f   :  { %v2297_v3 = vpop.eup %1731  ;;  %v1028_v62 = vsel %vm321_vm1, %v2289_v35, 0.0  ;;  %1737 = vpow2.f32 %v927_v33  ;;  %v830_v4 = vmax.f32 %v828_v1, %v829_v31  ;;  %v819_v57 = vmax.f32 %v817_v60, %v818_v14 }
 0x1a0   :  { %v1029_v17 = vsel %vm321_vm1, %v2297_v3, 0.0  ;;  %1739 = vpow2.f32 %v929_v15  ;;  %v843_v23 = vsel %vm321_vm1, %v2295_v29, -inf  ;;  %v2315_v1 = vadd.f32 %v1913_v36, %v2199_v8 }
 0x1a1   :  { %v2307_v45 = vpop.eup %1733  ;;  %v1030_v28 = vadd.f32 %v1029_v17, %v1028_v62  ;;  %1741 = vpow2.f32 %v923_v48  ;;  %v831_v38 = vrot.slane %v830_v4, 1  ;;  %v820_v59 = vrot.slane %v819_v57, 2 }
 0x1a2   :  { %v2309_v56 = vpop.eup %1735  ;;  %v1019_v49 = vsel %vm321_vm1, %v2307_v45, 0.0  ;;  %1743 = vpow2.f32 %v925_v30  ;;  %v844_v50 = vmax.f32 %v842_v11, %v843_v23  ;;  %v834_v14 = vsel %vm321_vm1, %v2315_v1, -inf }
 0x1a3   :  { %v1031_v60 = vrot.slane %v1030_v28, 4  ;;  %v1020_v53 = vsel %vm321_vm1, %v2309_v56, 0.0  ;;  %v832_v22 = vmax.f32 %v830_v4, %v831_v38  ;;  %v821_v33 = vmax.f32 %v819_v57, %v820_v59 }
 0x1a4   :  { %v1021_v15 = vadd.f32 %v1020_v53, %v1019_v49  ;;  %v845_v31 = vrot.slane %v844_v50, 4  ;;  %v961_v48 = vrot.slane %v2202_v42, 2  ;;  %v835_v23 = vmax.f32 %v833_v25, %v834_v14 }
 0x1a5   :  { %v2322_v62 = vadd.f32 %v1031_v60, %v1030_v28  ;;  %v877_v30 = vsub.f32 %v2227_v39, %v832_v22  ;;  %v878_v36 = vsub.f32 %v2241_v10, %v832_v22  ;;  %v822_v8 = vrot.slane %v821_v33, 1 }
 0x1a6   :  { %v1022_v11 = vrot.slane %v1021_v15, 4  ;;  %v846_v17 = vmax.f32 %v844_v50, %v845_v31  ;;  %v962_v4 = vadd.f32 %v961_v48, %v2202_v42  ;;  %v952_v49 = vrot.slane %v2213_v5, 2 }
 0x1a7   :  { %v935_v57 = vmul.f32 1.442695, %v877_v30  ;;  %v937_v38 = vmul.f32 1.442695, %v878_v36  ;;  %v823_v59 = vmax.f32 %v821_v33, %v822_v8  ;;  %v836_v28 = vrot.slane %v835_v23, 4 }
 0x1a8   :  { %v2328_v53 = vadd.f32 %v1022_v11, %v1021_v15  ;;  %v847_v0 = vrot.slane %v846_v17, 2  ;;  %v963_v60 = vrot.slane %v962_v4, 1  ;;  %v953_v25 = vadd.f32 %v952_v49, %v2213_v5 }
 0x1a9   :  { %v2330_v40 = vpop.eup %1737  ;;  %1745 = vpow2.f32 %v935_v57  ;;  %v875_v39 = vsub.f32 %v2253_v54, %v823_v59  ;;  %v876_v10 = vsub.f32 %v2264_v63, %v823_v59  ;;  %v837_v33 = vmax.f32 %v835_v23, %v836_v28 }
 0x1aa   :  { %v2335_v42 = vpop.eup %1739  ;;  %v1046_v50 = vsel %vm321_vm1, %v2330_v40, 0.0  ;;  %1747 = vpow2.f32 %v937_v38  ;;  %v848_v22 = vmax.f32 %v846_v17, %v847_v0  ;;  %v964_v54 = vadd.f32 %v963_v60, %v962_v4 }
 0x1ab   :  { %v2339_v15 = vpop.eup %1741  ;;  %v1047_v31 = vsel %vm321_vm1, %v2335_v42, 0.0  ;;  %v931_v14 = vmul.f32 1.442695, %v875_v39  ;;  %v933_v48 = vmul.f32 1.442695, %v876_v10  ;;  %v838_v8 = vrot.slane %v837_v33, 2 }
 0x1ac   :  { %v2343_v30 = vpop.eup %1743  ;;  %v1048_v63 = vadd.f32 %v1047_v31, %v1046_v50  ;;  %v1037_v5 = vsel %vm321_vm1, %v2339_v15, 0.0  ;;  %v849_v36 = vrot.slane %v848_v22, 1  ;;  %v954_v11 = vrot.slane %v953_v25, 1 }
 0x1ad   :  { %v1038_v0 = vsel %vm321_vm1, %v2343_v30, 0.0  ;;  %1749 = vpow2.f32 %v931_v14  ;;  %v979_v17 = vrot.slane %v2216_v13, 2  ;;  %v839_v4 = vmax.f32 %v837_v33, %v838_v8 }
 0x1ae   :  { %v1049_v23 = vrot.slane %v1048_v63, 4  ;;  %v1039_v57 = vadd.f32 %v1038_v0, %v1037_v5  ;;  %1751 = vpow2.f32 %v933_v48  ;;  %v850_v38 = vmax.f32 %v848_v22, %v849_v36 }
 0x1af   :  { %1753 = vrcp.f32 %v964_v54  ;;  %v955_v59 = vadd.f32 %v954_v11, %v953_v25  ;;  %v980_v49 = vadd.f32 %v979_v17, %v2216_v13  ;;  %v840_v50 = vrot.slane %v839_v4, 1 }
 0x1b0   :  { %v2351_v28 = vadd.f32 %v1049_v23, %v1048_v63  ;;  %v1040_v60 = vrot.slane %v1039_v57, 4  ;;  %v881_v39 = vsub.f32 %v2277_v18, %v850_v38  ;;  %v882_v10 = vsub.f32 %v2295_v29, %v850_v38 }
 0x1b1   :  { %1755 = vrcp.f32 %v955_v59  ;;  %v981_v31 = vrot.slane %v980_v49, 1  ;;  %v970_v14 = vrot.slane %v2219_v61, 2  ;;  %v997_v25 = vrot.slane %v2260_v7, 2 }
 0x1b2   :  { %v2356_v5 = vadd.f32 %v1040_v60, %v1039_v57  ;;  %v943_v22 = vmul.f32 1.442695, %v881_v39  ;;  %v945_v33 = vmul.f32 1.442695, %v882_v10  ;;  %v841_v13 = vmax.f32 %v839_v4, %v840_v50 }
 0x1b3   :  { %v2359_v48 = vpop.eup %1745  ;;  %v982_v54 = vadd.f32 %v981_v31, %v980_v49  ;;  %v971_v63 = vadd.f32 %v970_v14, %v2219_v61  ;;  %v988_v18 = vrot.slane %v2267_v6, 2  ;;  %v998_v8 = vadd.f32 %v997_v25, %v2260_v7 }
 0x1b4   :  { %v2363_v29 = vpop.eup %1747  ;;  %v1064_v36 = vsel %vm321_vm1, %v2359_v48, 0.0  ;;  %1757 = vpow2.f32 %v943_v22  ;;  %v1015_v0 = vrot.slane %v2271_v32, 2  ;;  %v879_v17 = vsub.f32 %v2287_v21, %v841_v13 }
 0x1b5   :  { %v1065_v11 = vsel %vm321_vm1, %v2363_v29, 0.0  ;;  %1759 = vpow2.f32 %v945_v33  ;;  %v880_v61 = vsub.f32 %v2315_v1, %v841_v13  ;;  %v972_v57 = vrot.slane %v971_v63, 1 }
 0x1b6   :  { %v1066_v23 = vadd.f32 %v1065_v11, %v1064_v36  ;;  %1761 = vrcp.f32 %v982_v54  ;;  %v999_v38 = vrot.slane %v998_v8, 1  ;;  %v939_v59 = vmul.f32 1.442695, %v879_v17 }
 0x1b7   :  { %v2373_v4 = vpop.eup %1749  ;;  %v941_v49 = vmul.f32 1.442695, %v880_v61  ;;  %v989_v7 = vadd.f32 %v988_v18, %v2267_v6  ;;  %v1016_v60 = vadd.f32 %v1015_v0, %v2271_v32  ;;  %v973_v50 = vadd.f32 %v972_v57, %v971_v63 }
 0x1b8   :  { %v2377_v39 = vpop.eup %1751  ;;  %v1067_v10 = vrot.slane %v1066_v23, 4  ;;  %v1055_v21 = vsel %vm321_vm1, %v2373_v4, 0.0  ;;  %v1000_v1 = vadd.f32 %v999_v38, %v998_v8  ;;  %1763 = vpow2.f32 %v939_v59 }
 0x1b9   :  { %v1754_v31 = vpop.eup %1753  ;;  %v1056_v14 = vsel %vm321_vm1, %v2377_v39, 0.0  ;;  %v990_v22 = vrot.slane %v989_v7, 1  ;;  %v1017_v33 = vrot.slane %v1016_v60, 1  ;;  %1765 = vpow2.f32 %v941_v49 }
 0x1ba   :  { %v2383_v25 = vadd.f32 %v1067_v10, %v1066_v23  ;;  %v1057_v6 = vadd.f32 %v1056_v14, %v1055_v21  ;;  %v1110_v32 = vmul.f32 %v1754_v31, %v2039_v55  ;;  %v1109_v54 = vmul.f32 %v1754_v31, %v2031_v51 }
 0x1bb   :  { %v1756_v13 = vpop.eup %1755  ;;  %1767 = vrcp.f32 %v973_v50  ;;  %v991_v18 = vadd.f32 %v990_v22, %v989_v7  ;;  %v1018_v63 = vadd.f32 %v1017_v33, %v1016_v60  ;;  %v1006_v61 = vrot.slane %v2281_v26, 2 }
 0x1bc   :  { %v1058_v36 = vrot.slane %v1057_v6, 4  ;;  %v1148_v8 = vsel %vm321_vm1, %v1110_v32, 0.0  ;;  %v1108_v0 = vmul.f32 %v1756_v13, %v2053_v12  ;;  %v1107_v11 = vmul.f32 %v1756_v13, %v2045_v2 }
 0x1bd   :  { %1149 = vadd.xlane.f32.xlu1 %v1148_v8  ;;  %v1145_v17 = vsel %vm321_vm1, %v1109_v54, 0.0  ;;  %1769 = vrcp.f32 %v1000_v1  ;;  %v1033_v55 = vrot.slane %v2322_v62, 2  ;;  %v1007_v59 = vadd.f32 %v1006_v61, %v2281_v26 }
 0x1be   :  { %v2393_v23 = vpop.eup %1757  ;;  %v2395_v51 = vadd.f32 %v1058_v36, %v1057_v6  ;;  %1146 = vadd.xlane.f32.xlu0 %v1145_v17  ;;  %v1142_v57 = vsel %vm321_vm1, %v1108_v0, 0.0  ;;  %v1139_v38 = vsel %vm321_vm1, %v1107_v11, 0.0  ;;  %1771 = vrcp.f32 %v991_v18 }
 0x1bf   :  { %v2399_v12 = vpop.eup %1759  ;;  %v1082_v2 = vsel %vm321_vm1, %v2393_v23, 0.0  ;;  %1773 = vrcp.f32 %v1018_v63  ;;  %v1034_v49 = vadd.f32 %v1033_v55, %v2322_v62  ;;  %v1024_v10 = vrot.slane %v2328_v53, 2 }
 0x1c0   :  { %v1762_v7 = vpop.eup %1761  ;;  %v1083_v60 = vsel %vm321_vm1, %v2399_v12, 0.0  ;;  %v1051_v21 = vrot.slane %v2351_v28, 2  ;;  %v1042_v50 = vrot.slane %v2356_v5, 2  ;;  %v1008_v22 = vrot.slane %v1007_v59, 1 }
 0x1c1   :  { %v1084_v1 = vadd.f32 %v1083_v60, %v1082_v2  ;;  %1143 = vadd.xlane.f32.xlu1 %v1142_v57  ;;  %v1114_v31 = vmul.f32 %v1762_v7, %v2079_v58  ;;  %v1113_v14 = vmul.f32 %v1762_v7, %v2073_v27  ;;  %v1035_v26 = vrot.slane %v1034_v49, 1 }
 0x1c2   :  { %1140 = vadd.xlane.f32.xlu0 %v1139_v38  ;;  %v1025_v62 = vadd.f32 %v1024_v10, %v2328_v53  ;;  %v1052_v33 = vadd.f32 %v1051_v21, %v2351_v28  ;;  %v1043_v6 = vadd.f32 %v1042_v50, %v2356_v5  ;;  %v2415_v32 = vpop.eup %1763  ;;  %v1009_v63 = vadd.f32 %v1008_v22, %v1007_v59 }
 0x1c3   :  { %v1085_v13 = vrot.slane %v1084_v1, 4  ;;  %v1160_v54 = vsel %vm321_vm1, %v1114_v31, 0.0  ;;  %v1157_v18 = vsel %vm321_vm1, %v1113_v14, 0.0  ;;  %v2419_v58 = vpop.eup %1765  ;;  %v1073_v27 = vsel %vm321_vm1, %v2415_v32, 0.0 }
 0x1c4   :  { %v1036_v36 = vadd.f32 %v1035_v26, %v1034_v49  ;;  %v1026_v8 = vrot.slane %v1025_v62, 1  ;;  %v1053_v53 = vrot.slane %v1052_v33, 1  ;;  %v1074_v5 = vsel %vm321_vm1, %v2419_v58, 0.0 }
 0x1c5   :  { %v1768_v0 = vpop.eup %1767  ;;  %v1086_v28 = vadd.f32 %v1085_v13, %v1084_v1  ;;  %1161 = vadd.xlane.f32.xlu1 %v1160_v54  ;;  %1775 = vrcp.f32 %v1009_v63  ;;  %v1044_v11 = vrot.slane %v1043_v6, 1  ;;  %v1075_v17 = vadd.f32 %v1074_v5, %v1073_v27 }
 0x1c6   :  { %1158 = vadd.xlane.f32.xlu0 %v1157_v18  ;;  %v1112_v61 = vmul.f32 %v1768_v0, %v2093_v20  ;;  %v1111_v55 = vmul.f32 %v1768_v0, %v2087_v9  ;;  %1777 = vrcp.f32 %v1036_v36  ;;  %v1027_v38 = vadd.f32 %v1026_v8, %v1025_v62 }
 0x1c7   :  { %v1770_v57 = vpop.eup %1769  ;;  %v1054_v2 = vadd.f32 %v1053_v53, %v1052_v33  ;;  %v1045_v59 = vadd.f32 %v1044_v11, %v1043_v6  ;;  %v1069_v49 = vrot.slane %v2383_v25, 2  ;;  %v1076_v60 = vrot.slane %v1075_v17, 4 }
 0x1c8   :  { %v1772_v7 = vpop.eup %1771  ;;  %v1154_v10 = vsel %vm321_vm1, %v1112_v61, 0.0  ;;  %v1151_v21 = vsel %vm321_vm1, %v1111_v55, 0.0  ;;  %v1118_v50 = vmul.f32 %v1770_v57, %v2147_v41  ;;  %v1117_v20 = vmul.f32 %v1770_v57, %v2143_v34 }
 0x1c9   :  { %v1774_v1 = vpop.eup %1773  ;;  %1155 = vadd.xlane.f32.xlu1 %v1154_v10  ;;  %v1116_v9 = vmul.f32 %v1772_v7, %v2158_v47  ;;  %v1115_v31 = vmul.f32 %v1772_v7, %v2154_v16  ;;  %1779 = vrcp.f32 %v1027_v38  ;;  %v1077_v14 = vadd.f32 %v1076_v60, %v1075_v17 }
 0x1ca   :  { %1152 = vadd.xlane.f32.xlu0 %v1151_v21  ;;  %v1172_v22 = vsel %vm321_vm1, %v1118_v50, 0.0  ;;  %v1122_v26 = vmul.f32 %v1774_v1, %v2229_v24  ;;  %v1121_v62 = vmul.f32 %v1774_v1, %v2222_v19  ;;  %v1169_v33 = vsel %vm321_vm1, %v1117_v20, 0.0 }
 0x1cb   :  { %1781 = vrcp.f32 %v1054_v2  ;;  %v1070_v41 = vadd.f32 %v1069_v49, %v2383_v25  ;;  %v1060_v47 = vrot.slane %v2395_v51, 2  ;;  %v1078_v34 = vrot.slane %v1077_v14, 2 }
 0x1cc   :  { %1783 = vrcp.f32 %v1045_v59  ;;  %v1087_v16 = vrot.slane %v1086_v28, 2  ;;  %v1166_v54 = vsel %vm321_vm1, %v1116_v9, 0.0  ;;  %v1163_v27 = vsel %vm321_vm1, %v1115_v31, 0.0 }
 0x1cd   :  { %1173 = vadd.xlane.f32.xlu1 %v1172_v22  ;;  %v1071_v6 = vrot.slane %v1070_v41, 1  ;;  %v1061_v24 = vadd.f32 %v1060_v47, %v2395_v51  ;;  %v1079_v18 = vadd.f32 %v1078_v34, %v1077_v14  ;;  %v1184_v51 = vsel %vm321_vm1, %v1122_v26, 0.0 }
 0x1ce   :  { %1170 = vadd.xlane.f32.xlu0 %v1169_v33  ;;  %v1088_v19 = vadd.f32 %v1087_v16, %v1086_v28  ;;  %v1181_v61 = vsel %vm321_vm1, %v1121_v62, 0.0  ;;  %v1412_v33 = vld [vmem:[%s2615_s5] sm:$0xff] }
 0x1cf   :  { %v1776_v13 = vpop.eup %1775  ;;  %v1072_v8 = vadd.f32 %v1071_v6, %v1070_v41  ;;  %v1062_v5 = vrot.slane %v1061_v24, 1  ;;  %v1080_v11 = vrot.slane %v1079_v18, 1  ;;  %1686 = vmatprep.subr.mxu0 %v1412_v33  ;;  %v2487_v6 = vld [vmem:[%s2612_s2] ss:$0 sm:$0xff] }
 0x1d0   :  { %v1778_v63 = vpop.eup %1777  ;;  %v1120_v36 = vmul.f32 %v1776_v13, %v2243_v44  ;;  %v1119_v25 = vmul.f32 %v1776_v13, %v2235_v52  ;;  %v1089_v28 = vrot.slane %v1088_v19, 1  ;;  %1687 = vmatpush3.msra.mxu0 %v1412_v33  ;;  %v420_v13 = vadd.f32 %v1925_v43, %v2487_v6 }
 0x1d1   :  { %1167 = vadd.xlane.f32.xlu1 %v1166_v54  ;;  %v1126_v53 = vmul.f32 %v1778_v63, %v2297_v3  ;;  %v1125_v0 = vmul.f32 %v1778_v63, %v2289_v35  ;;  %1785 = vrcp.f32 %v1072_v8  ;;  %v1063_v55 = vadd.f32 %v1062_v5, %v1061_v24 }
 0x1d2   :  { %1164 = vadd.xlane.f32.xlu0 %v1163_v27  ;;  %v1081_v44 = vadd.f32 %v1080_v11, %v1079_v18  ;;  %v1090_v38 = vadd.f32 %v1089_v28, %v1088_v19  ;;  %v1178_v60 = vsel %vm321_vm1, %v1120_v36, 0.0  ;;  %v417_v54 = vadd.f32 %v1915_v37, %v2487_v6 }
 0x1d3   :  { %v1780_v17 = vpop.eup %1779  ;;  %1787 = vrcp.f32 %v1063_v55  ;;  %v1193_v10 = vsel %vm321_vm1, %v1125_v0, 0.0  ;;  %v412_v27 = vadd.f32 %v2487_v6, %v1928_v46  ;;  %v2649_v46 = vld [vmem:[#allocation6_spill] sm:$0xff] }
 0x1d4   :  { %v1124_v52 = vmul.f32 %v1780_v17, %v2309_v56  ;;  %v1123_v57 = vmul.f32 %v1780_v17, %v2307_v45  ;;  %1789 = vrcp.f32 %v1081_v44  ;;  %v1175_v45 = vsel %vm321_vm1, %v1119_v25, 0.0  ;;  %v2647_v25 = vld [vmem:[#allocation5_spill] sm:$0xff] }
 0x1d5   :  { %v1782_v3 = vpop.eup %1781  ;;  %1185 = vadd.xlane.f32.xlu1 %v1184_v51  ;;  %1791 = vrcp.f32 %v1090_v38  ;;  %v1196_v56 = vsel %vm321_vm1, %v1126_v53, 0.0  ;;  %v409_v8 = vadd.f32 %v2487_v6, %v2647_v25  ;;  %v2648_v51 = vld [vmem:[#allocation8_spill] sm:$0xff]  ;;  %v433_v55 = vadd.f32 %v2649_v46, %v2487_v6 }
 0x1d6   :  { %v1784_v35 = vpop.eup %1783  ;;  %1182 = vadd.xlane.f32.xlu0 %v1181_v61  ;;  %v1130_v2 = vmul.f32 %v1782_v3, %v2335_v42  ;;  %v1129_v59 = vmul.f32 %v1782_v3, %v2330_v40  ;;  %v1187_v9 = vsel %vm321_vm1, %v1123_v57, 0.0  ;;  %v436_v28 = vadd.f32 %v2648_v51, %v2487_v6  ;;  %v2657_v46 = vld [vmem:[#allocation16_spill] sm:$0xff] }
 0x1d7   :  { %v1128_v49 = vmul.f32 %v1784_v35, %v2343_v30  ;;  %v1127_v7 = vmul.f32 %v1784_v35, %v2339_v15  ;;  %v1190_v30 = vsel %vm321_vm1, %v1124_v52, 0.0 }
 0x1d8   :  { %v1208_v14 = vsel %vm321_vm1, %v1130_v2, 0.0  ;;  %v1205_v22 = vsel %vm321_vm1, %v1129_v59, 0.0  ;;  %v2650_v59 = vld [vmem:[#allocation9_spill] sm:$0xff] }
 0x1d9   :  { %1179 = vadd.xlane.f32.xlu1 %v1178_v60  ;;  %v1199_v62 = vsel %vm321_vm1, %v1127_v7, 0.0 }
 0x1da   :  { %1176 = vadd.xlane.f32.xlu0 %v1175_v45 }
 0x1db   :  { %v1786_v21 = vpop.eup %1785 }
 0x1dc   :  { %v1134_v40 = vmul.f32 %v1786_v21, %v2363_v29  ;;  %v1133_v42 = vmul.f32 %v1786_v21, %v2359_v48 }
 0x1dd   :  { %1197 = vadd.xlane.f32.xlu1 %v1196_v56  ;;  %v1788_v15 = vpop.eup %1787  ;;  %v2651_v56 = vld [vmem:[#allocation7_spill] sm:$0xff] }
 0x1de   :  { %1194 = vadd.xlane.f32.xlu0 %v1193_v10  ;;  %v1132_v50 = vmul.f32 %v1788_v15, %v2377_v39  ;;  %v1131_v1 = vmul.f32 %v1788_v15, %v2373_v4  ;;  %v1790_v20 = vpop.eup %1789  ;;  %v1202_v4 = vsel %vm321_vm1, %v1128_v49, 0.0  ;;  %v428_v49 = vadd.f32 %v2487_v6, %v2650_v59 }
 0x1df   :  { %v1792_v31 = vpop.eup %1791  ;;  %v1136_v29 = vmul.f32 %v1790_v20, %v2419_v58  ;;  %v1135_v48 = vmul.f32 %v1790_v20, %v2415_v32  ;;  %v1220_v32 = vsel %vm321_vm1, %v1134_v40, 0.0  ;;  %v1217_v58 = vsel %vm321_vm1, %v1133_v42, 0.0 }
 0x1e0   :  { %v1138_v26 = vmul.f32 %v1792_v31, %v2399_v12  ;;  %v1137_v39 = vmul.f32 %v1792_v31, %v2393_v23  ;;  %v1214_v23 = vsel %vm321_vm1, %v1132_v50, 0.0  ;;  %v1211_v12 = vsel %vm321_vm1, %v1131_v1, 0.0 }
 0x1e1   :  { %1191 = vadd.xlane.f32.xlu1 %v1190_v30  ;;  %v1226_v41 = vsel %vm321_vm1, %v1136_v29, 0.0  ;;  %v1223_v47 = vsel %vm321_vm1, %v1135_v48, 0.0  ;;  %v425_v10 = vadd.f32 %v2487_v6, %v2651_v56  ;;  %v2652_v29 = vld [vmem:[#allocation10_spill] sm:$0xff] }
 0x1e2   :  { %1188 = vadd.xlane.f32.xlu0 %v1187_v9  ;;  %v1232_v34 = vsel %vm321_vm1, %v1138_v26, 0.0  ;;  %v1229_v16 = vsel %vm321_vm1, %v1137_v39, 0.0  ;;  %v449_v48 = vadd.f32 %v2652_v29, %v2487_v6 }
 0x1e5   :  { %1209 = vadd.xlane.f32.xlu1 %v1208_v14 }
 0x1e6   :  { %1206 = vadd.xlane.f32.xlu0 %v1205_v22  ;;  %v2653_v22 = vld [vmem:[#allocation12_spill] sm:$0xff] }
 0x1e7   :  { %v452_v26 = vadd.f32 %v2653_v22, %v2487_v6 }
 0x1e9   :  { %1203 = vadd.xlane.f32.xlu1 %v1202_v4 }
 0x1ea   :  { %1200 = vadd.xlane.f32.xlu0 %v1199_v62 }
 0x1ed   :  { %1221 = vadd.xlane.f32.xlu1 %v1220_v32 }
 0x1ee   :  { %1218 = vadd.xlane.f32.xlu0 %v1217_v58 }
 0x1f1   :  { %1215 = vadd.xlane.f32.xlu1 %v1214_v23 }
 0x1f2   :  { %1212 = vadd.xlane.f32.xlu0 %v1211_v12 }
 0x1f5   :  { %1227 = vadd.xlane.f32.xlu1 %v1226_v41 }
 0x1f6   :  { %1224 = vadd.xlane.f32.xlu0 %v1223_v47  ;;  %v2654_v47 = vld [vmem:[#allocation11_spill] sm:$0xff] }
 0x1f9   :  { %1233 = vadd.xlane.f32.xlu1 %v1232_v34  ;;  %v441_v34 = vadd.f32 %v2487_v6, %v2654_v47 }
 0x1fa   :  { %1230 = vadd.xlane.f32.xlu0 %v1229_v16 }
 0x24a   :  { %v1150_v24 = vpop.xlane.xlu1 %1149 }
 0x24b   :  { %v1238_v18 = vmul.f32 %v1150_v24, %v420_v13  ;;  %v1147_v19 = vpop.xlane.xlu0 %1146  ;;  %v2655_v24 = vld [vmem:[#allocation13_spill] sm:$0xff] }
 0x24c   :  { %v1237_v63 = vmul.f32 %v1147_v19, %v417_v54 }
 0x24d   :  { %v1278_v36 = vsel %vm1267_vm2, %v1238_v18, 0.0  ;;  %v444_v18 = vadd.f32 %v2487_v6, %v2655_v24 }
 0x24e   :  { %v1277_v53 = vsel %vm1267_vm2, %v1237_v63, 0.0  ;;  %v1144_v0 = vpop.xlane.xlu1 %1143 }
 0x24f   :  { %v1279_v43 = vadd.f32 %v1278_v36, %v1277_v53  ;;  %v1236_v5 = vmul.f32 %v1144_v0, %v412_v27  ;;  %v1141_v11 = vpop.xlane.xlu0 %1140 }
 0x250   :  { %v1235_v37 = vmul.f32 %v1141_v11, %v409_v8 }
 0x251   :  { %v1280_v17 = vrot.slane %v1279_v43, 4  ;;  %v1269_v61 = vsel %vm1267_vm2, %v1236_v5, 0.0 }
 0x252   :  { %v1268_v44 = vsel %vm1267_vm2, %v1235_v37, 0.0  ;;  %v1162_v52 = vpop.xlane.xlu1 %1161 }
 0x253   :  { %v1281_v57 = vadd.f32 %v1280_v17, %v1279_v43  ;;  %v1270_v38 = vadd.f32 %v1269_v61, %v1268_v44  ;;  %v1242_v3 = vmul.f32 %v1162_v52, %v436_v28  ;;  %v1159_v35 = vpop.xlane.xlu0 %1158  ;;  %v2656_v17 = vld [vmem:[#allocation14_spill] sm:$0xff] }
 0x254   :  { %v1241_v2 = vmul.f32 %v1159_v35, %v433_v55  ;;  %v465_v61 = vadd.f32 %v2656_v17, %v2487_v6  ;;  %v468_v55 = vadd.f32 %v2657_v46, %v2487_v6 }
 0x255   :  { %v1282_v7 = vrot.slane %v1281_v57, 2  ;;  %v1271_v60 = vrot.slane %v1270_v38, 4  ;;  %v1296_v45 = vsel %vm1267_vm2, %v1242_v3, 0.0 }
 0x256   :  { %v1295_v21 = vsel %vm1267_vm2, %v1241_v2, 0.0  ;;  %v1156_v40 = vpop.xlane.xlu1 %1155 }
 0x257   :  { %v1283_v42 = vadd.f32 %v1282_v7, %v1281_v57  ;;  %v1272_v15 = vadd.f32 %v1271_v60, %v1270_v38  ;;  %v1297_v30 = vadd.f32 %v1296_v45, %v1295_v21  ;;  %v1240_v50 = vmul.f32 %v1156_v40, %v428_v49  ;;  %v1153_v1 = vpop.xlane.xlu0 %1152  ;;  %v2658_v60 = vld [vmem:[#allocation15_spill] sm:$0xff]  ;;  %v2659_v40 = vld [vmem:[#allocation17_spill] sm:$0xff] }
 0x258   :  { %v1239_v20 = vmul.f32 %v1153_v1, %v425_v10  ;;  %v457_v45 = vadd.f32 %v2487_v6, %v2658_v60 }
 0x259   :  { %v1273_v9 = vrot.slane %v1272_v15, 2  ;;  %v1298_v31 = vrot.slane %v1297_v30, 4  ;;  %v1287_v14 = vsel %vm1267_vm2, %v1240_v50, 0.0  ;;  %v1284_v62 = vrot.slane %v1283_v42, 1 }
 0x25a   :  { %v1286_v39 = vsel %vm1267_vm2, %v1239_v20, 0.0  ;;  %v1174_v4 = vpop.xlane.xlu1 %1173 }
 0x25b   :  { %v1274_v33 = vadd.f32 %v1273_v9, %v1272_v15  ;;  %v1299_v32 = vadd.f32 %v1298_v31, %v1297_v30  ;;  %v1288_v58 = vadd.f32 %v1287_v14, %v1286_v39  ;;  %v1171_v23 = vpop.xlane.xlu0 %1170  ;;  %v1246_v12 = vmul.f32 %v1174_v4, %v452_v26  ;;  %v2660_v26 = vld [vmem:[#allocation18_spill] sm:$0xff] }
 0x25c   :  { %v1245_v41 = vmul.f32 %v1171_v23, %v449_v48  ;;  %v1285_v36 = vadd.f32 %v1284_v62, %v1283_v42  ;;  %v460_v42 = vadd.f32 %v2487_v6, %v2659_v40  ;;  %v481_v39 = vadd.f32 %v2660_v26, %v2487_v6 }
 0x25d   :  { %v1275_v16 = vrot.slane %v1274_v33, 1  ;;  %v1300_v13 = vrot.slane %v1299_v32, 2  ;;  %v1289_v54 = vrot.slane %v1288_v58, 4  ;;  %v1314_v19 = vsel %vm1267_vm2, %v1246_v12, 0.0 }
 0x25e   :  { %v1313_v63 = vsel %vm1267_vm2, %v1245_v41, 0.0  ;;  %v1168_v27 = vpop.xlane.xlu1 %1167 }
 0x25f   :  { %v1276_v25 = vadd.f32 %v1275_v16, %v1274_v33  ;;  %v1290_v8 = vadd.f32 %v1289_v54, %v1288_v58  ;;  %v1315_v53 = vadd.f32 %v1314_v19, %v1313_v63  ;;  %v1165_v0 = vpop.xlane.xlu0 %1164  ;;  %v1301_v43 = vadd.f32 %v1300_v13, %v1299_v32  ;;  %v2661_v32 = vld [vmem:[#allocation20_spill] sm:$0xff]  ;;  %v2662_v63 = vld [vmem:[#allocation19_spill] sm:$0xff] }
 0x260   :  { %v1244_v5 = vmul.f32 %v1168_v27, %v444_v18  ;;  %v1243_v11 = vmul.f32 %v1165_v0, %v441_v34  ;;  %v484_v58 = vadd.f32 %v2661_v32, %v2487_v6  ;;  %v473_v27 = vadd.f32 %v2487_v6, %v2662_v63 }
 0x261   :  { %v1437_v37 = vsel %vm1436_vm3, %v1285_v36, %v1276_v25  ;;  %v1291_v51 = vrot.slane %v1290_v8, 2  ;;  %v1316_v28 = vrot.slane %v1315_v53, 4  ;;  %v1302_v59 = vrot.slane %v1301_v43, 1 }
 0x262   :  { %v1305_v44 = vsel %vm1267_vm2, %v1244_v5, 0.0  ;;  %v1304_v52 = vsel %vm1267_vm2, %v1243_v11, 0.0  ;;  %v1186_v57 = vpop.xlane.xlu1 %1185 }
 0x263   :  { %v1292_v38 = vadd.f32 %v1291_v51, %v1290_v8  ;;  %v1317_v3 = vadd.f32 %v1316_v28, %v1315_v53  ;;  %v1306_v35 = vadd.f32 %v1305_v44, %v1304_v52  ;;  %v1183_v2 = vpop.xlane.xlu0 %1182  ;;  %v1250_v49 = vmul.f32 %v1186_v57, %v468_v55  ;;  %v2663_v53 = vld [vmem:[#allocation21_spill] sm:$0xff]  ;;  %v2664_v52 = vld [vmem:[#allocation24_spill] sm:$0xff] }
 0x264   :  { %v1249_v7 = vmul.f32 %v1183_v2, %v465_v61  ;;  %v1303_v14 = vadd.f32 %v1302_v59, %v1301_v43  ;;  %v476_v0 = vadd.f32 %v2487_v6, %v2663_v53  ;;  %v500_v57 = vadd.f32 %v2664_v52, %v2487_v6  ;;  %v2665_v2 = vld [vmem:[#allocation22_spill] sm:$0xff] }
 0x265   :  { %v1293_v56 = vrot.slane %v1292_v38, 1  ;;  %v1318_v10 = vrot.slane %v1317_v3, 2  ;;  %v1307_v21 = vrot.slane %v1306_v35, 4  ;;  %v1332_v15 = vsel %vm1267_vm2, %v1250_v49, 0.0 }
 0x266   :  { %v1331_v30 = vsel %vm1267_vm2, %v1249_v7, 0.0  ;;  %v1180_v50 = vpop.xlane.xlu1 %1179  ;;  %v497_v59 = vadd.f32 %v2665_v2, %v2487_v6 }
 0x267   :  { %v1294_v1 = vadd.f32 %v1293_v56, %v1292_v38  ;;  %v1308_v20 = vadd.f32 %v1307_v21, %v1306_v35  ;;  %v1333_v9 = vadd.f32 %v1332_v15, %v1331_v30  ;;  %v1177_v31 = vpop.xlane.xlu0 %1176  ;;  %v1319_v29 = vadd.f32 %v1318_v10, %v1317_v3  ;;  %v2666_v15 = vld [vmem:[#allocation23_spill] sm:$0xff] }
 0x268   :  { %v1248_v48 = vmul.f32 %v1180_v50, %v460_v42  ;;  %v1247_v22 = vmul.f32 %v1177_v31, %v457_v45  ;;  %v489_v30 = vadd.f32 %v2487_v6, %v2666_v15 }
 0x269   :  { %v1439_v4 = vsel %vm1438_vm4, %v1294_v1, %v1437_v37  ;;  %v1309_v62 = vrot.slane %v1308_v20, 2  ;;  %v1334_v33 = vrot.slane %v1333_v9, 4  ;;  %v1320_v24 = vrot.slane %v1319_v29, 1 }
 0x26a   :  { %v1323_v23 = vsel %vm1267_vm2, %v1248_v48, 0.0  ;;  %v1322_v12 = vsel %vm1267_vm2, %v1247_v22, 0.0  ;;  %v1198_v41 = vpop.xlane.xlu1 %1197  ;;  %v1441_v47 = vsel %vm1440_vm5, %v1303_v14, %v1439_v4 }
 0x26b   :  { %v1310_v34 = vadd.f32 %v1309_v62, %v1308_v20  ;;  %v1335_v16 = vadd.f32 %v1334_v33, %v1333_v9  ;;  %v1324_v13 = vadd.f32 %v1323_v23, %v1322_v12  ;;  %v1195_v54 = vpop.xlane.xlu0 %1194  ;;  %v1254_v18 = vmul.f32 %v1198_v41, %v484_v58  ;;  %v2668_v41 = vld [vmem:[#allocation26_spill] sm:$0xff] }
 0x26c   :  { %v1253_v19 = vmul.f32 %v1195_v54, %v481_v39  ;;  %v1321_v61 = vadd.f32 %v1320_v24, %v1319_v29  ;;  %v2667_v29 = vld [vmem:[#allocation25_spill] sm:$0xff]  ;;  %v2669_v54 = vld [vmem:[#allocation28_spill] sm:$0xff] }
 0x26d   :  { %v1311_v36 = vrot.slane %v1310_v34, 1  ;;  %v1336_v25 = vrot.slane %v1335_v16, 2  ;;  %v1325_v8 = vrot.slane %v1324_v13, 4  ;;  %v1350_v43 = vsel %vm1267_vm2, %v1254_v18, 0.0 }
 0x26e   :  { %v1349_v5 = vsel %vm1267_vm2, %v1253_v19, 0.0  ;;  %v1192_v11 = vpop.xlane.xlu1 %1191  ;;  %v492_v48 = vadd.f32 %v2487_v6, %v2667_v29  ;;  %v516_v24 = vadd.f32 %v2669_v54, %v2487_v6 }
 0x26f   :  { %v1312_v37 = vadd.f32 %v1311_v36, %v1310_v34  ;;  %v1326_v51 = vadd.f32 %v1325_v8, %v1324_v13  ;;  %v1351_v28 = vadd.f32 %v1350_v43, %v1349_v5  ;;  %v1189_v17 = vpop.xlane.xlu0 %1188  ;;  %v1337_v46 = vadd.f32 %v1336_v25, %v1335_v16 }
 0x270   :  { %v1252_v55 = vmul.f32 %v1192_v11, %v476_v0  ;;  %v1251_v44 = vmul.f32 %v1189_v17, %v473_v27 }
 0x271   :  { %v1327_v38 = vrot.slane %v1326_v51, 2  ;;  %v1352_v3 = vrot.slane %v1351_v28, 4  ;;  %v1443_v35 = vsel %vm1442_vm6, %v1312_v37, %v1441_v47  ;;  %v1338_v50 = vrot.slane %v1337_v46, 1 }
 0x272   :  { %v1341_v49 = vsel %vm1267_vm2, %v1252_v55, 0.0  ;;  %v1340_v7 = vsel %vm1267_vm2, %v1251_v44, 0.0  ;;  %v1210_v60 = vpop.xlane.xlu1 %1209  ;;  %v1445_v45 = vsel %vm1444_vm7, %v1321_v61, %v1443_v35  ;;  %v513_v47 = vadd.f32 %v2668_v41, %v2487_v6  ;;  %v2671_v61 = vld [vmem:[#allocation29_spill] sm:$0xff] }
 0x273   :  { %v1328_v56 = vadd.f32 %v1327_v38, %v1326_v51  ;;  %v1353_v10 = vadd.f32 %v1352_v3, %v1351_v28  ;;  %v1342_v21 = vadd.f32 %v1341_v49, %v1340_v7  ;;  %v1258_v40 = vmul.f32 %v1210_v60, %v500_v57  ;;  %v1207_v42 = vpop.xlane.xlu0 %1206  ;;  %v2670_v28 = vld [vmem:[#allocation27_spill] sm:$0xff] }
 0x274   :  { %v1257_v1 = vmul.f32 %v1207_v42, %v497_v59  ;;  %v1339_v12 = vadd.f32 %v1338_v50, %v1337_v46  ;;  %v505_v17 = vadd.f32 %v2487_v6, %v2670_v28  ;;  %v508_v46 = vadd.f32 %v2487_v6, %v2671_v61 }
 0x275   :  { %v1329_v20 = vrot.slane %v1328_v56, 1  ;;  %v1354_v9 = vrot.slane %v1353_v10, 2  ;;  %v1343_v31 = vrot.slane %v1342_v21, 4  ;;  %v1368_v14 = vsel %vm1267_vm2, %v1258_v40, 0.0  ;;  %v2673_v40 = vld [vmem:[#allocation33_spill] sm:$0xff] }
 0x276   :  { %v1367_v22 = vsel %vm1267_vm2, %v1257_v1, 0.0  ;;  %v1204_v26 = vpop.xlane.xlu1 %1203  ;;  %v524_v42 = vadd.f32 %v2487_v6, %v2673_v40 }
 0x277   :  { %v1330_v39 = vadd.f32 %v1329_v20, %v1328_v56  ;;  %v1355_v4 = vadd.f32 %v1354_v9, %v1353_v10  ;;  %v1344_v62 = vadd.f32 %v1343_v31, %v1342_v21  ;;  %v1369_v33 = vadd.f32 %v1368_v14, %v1367_v22  ;;  %v1201_v32 = vpop.xlane.xlu0 %1200  ;;  %v2672_v10 = vld [vmem:[#allocation31_spill] sm:$0xff] }
 0x278   :  { %v1256_v58 = vmul.f32 %v1204_v26, %v492_v48  ;;  %v1255_v23 = vmul.f32 %v1201_v32, %v489_v30  ;;  %v521_v21 = vadd.f32 %v2487_v6, %v2672_v10 }
 0x279   :  { %v1345_v34 = vrot.slane %v1344_v62, 2  ;;  %v1370_v16 = vrot.slane %v1369_v33, 4  ;;  %v1447_v13 = vsel %vm1446_vm8, %v1330_v39, %v1445_v45  ;;  %v1356_v36 = vrot.slane %v1355_v4, 1 }
 0x27a   :  { %v1359_v18 = vsel %vm1267_vm2, %v1256_v58, 0.0  ;;  %v1358_v19 = vsel %vm1267_vm2, %v1255_v23, 0.0  ;;  %v1222_v63 = vpop.xlane.xlu1 %1221  ;;  %v1449_v27 = vsel %vm1448_vm9, %v1339_v12, %v1447_v13 }
 0x27b   :  { %v1346_v25 = vadd.f32 %v1345_v34, %v1344_v62  ;;  %v1371_v8 = vadd.f32 %v1370_v16, %v1369_v33  ;;  %v1360_v53 = vadd.f32 %v1359_v18, %v1358_v19  ;;  %1688 = vmatprep.mubr.msk.f32.mxu0 %vm1267_vm2, %v1449_v27  ;;  %v1219_v0 = vpop.xlane.xlu0 %1218  ;;  %v1262_v43 = vmul.f32 %v1222_v63, %v516_v24  ;;  %v2675_v33 = vld [vmem:[#allocation32_spill] sm:$0xff] }
 0x27c   :  { %v1261_v5 = vmul.f32 %v1219_v0, %v513_v47  ;;  %v1357_v57 = vadd.f32 %v1356_v36, %v1355_v4  ;;  %v2674_v4 = vld [vmem:[#allocation30_spill] sm:$0xff]  ;;  %v532_v32 = vadd.f32 %v2675_v33, %v2487_v6 }
 0x27d   :  { %v1347_v11 = vrot.slane %v1346_v25, 1  ;;  %v1372_v37 = vrot.slane %v1371_v8, 2  ;;  %v1361_v51 = vrot.slane %v1360_v53, 4  ;;  %v1386_v55 = vsel %vm1267_vm2, %v1262_v43, 0.0 }
 0x27e   :  { %v1385_v44 = vsel %vm1267_vm2, %v1261_v5, 0.0  ;;  %v1216_v52 = vpop.xlane.xlu1 %1215  ;;  %v529_v62 = vadd.f32 %v2674_v4, %v2487_v6 }
 0x27f   :  { %v1348_v38 = vadd.f32 %v1347_v11, %v1346_v25  ;;  %v1362_v3 = vadd.f32 %v1361_v51, %v1360_v53  ;;  %v1387_v35 = vadd.f32 %v1386_v55, %v1385_v44  ;;  %v1213_v2 = vpop.xlane.xlu0 %1212  ;;  %v1373_v59 = vadd.f32 %v1372_v37, %v1371_v8 }
 0x280   :  { %v1260_v49 = vmul.f32 %v1216_v52, %v508_v46  ;;  %v1259_v7 = vmul.f32 %v1213_v2, %v505_v17 }
 0x281   :  { %v1450_v60 = vsel %vm1436_vm3, %v1357_v57, %v1348_v38  ;;  %v1363_v45 = vrot.slane %v1362_v3, 2  ;;  %v1388_v56 = vrot.slane %v1387_v35, 4  ;;  %v1374_v14 = vrot.slane %v1373_v59, 1 }
 0x282   :  { %v1377_v15 = vsel %vm1267_vm2, %v1260_v49, 0.0  ;;  %v1376_v30 = vsel %vm1267_vm2, %v1259_v7, 0.0  ;;  %v1228_v50 = vpop.xlane.xlu1 %1227  ;;  %v1578_v49 = vld [vmem:[%s2616_s6] ss:$0 sm:$0xff] }
 0x283   :  { %v1364_v1 = vadd.f32 %v1363_v45, %v1362_v3  ;;  %v1389_v20 = vadd.f32 %v1388_v56, %v1387_v35  ;;  %v1378_v9 = vadd.f32 %v1377_v15, %v1376_v30  ;;  %v1225_v31 = vpop.xlane.xlu0 %1224  ;;  %v1264_v29 = vmul.f32 %v1228_v50, %v524_v42 }
 0x284   :  { %v1263_v48 = vmul.f32 %v1225_v31, %v521_v21  ;;  %v1375_v13 = vadd.f32 %v1374_v14, %v1373_v59 }
 0x285   :  { %v1365_v22 = vrot.slane %v1364_v1, 1  ;;  %v1390_v26 = vrot.slane %v1389_v20, 2  ;;  %v1379_v39 = vrot.slane %v1378_v9, 4  ;;  %v1395_v58 = vsel %vm1267_vm2, %v1264_v29, 0.0 }
 0x286   :  { %v1394_v23 = vsel %vm1267_vm2, %v1263_v48, 0.0  ;;  %v1234_v12 = vpop.xlane.xlu1 %1233 }
 0x287   :  { %v1366_v41 = vadd.f32 %v1365_v22, %v1364_v1  ;;  %v1380_v47 = vadd.f32 %v1379_v39, %v1378_v9  ;;  %v1396_v34 = vadd.f32 %v1395_v58, %v1394_v23  ;;  %v1231_v16 = vpop.xlane.xlu0 %1230  ;;  %v1391_v54 = vadd.f32 %v1390_v26, %v1389_v20 }
 0x288   :  { %v1266_v24 = vmul.f32 %v1234_v12, %v532_v32  ;;  %v1265_v18 = vmul.f32 %v1231_v16, %v529_v62 }
 0x289   :  { %v1451_v19 = vsel %vm1438_vm4, %v1366_v41, %v1450_v60  ;;  %v1381_v63 = vrot.slane %v1380_v47, 2  ;;  %v1397_v27 = vrot.slane %v1396_v34, 4  ;;  %v1392_v43 = vrot.slane %v1391_v54, 1 }
 0x28a   :  { %v1452_v36 = vsel %vm1440_vm5, %v1375_v13, %v1451_v19  ;;  %v1404_v6 = vsel %vm1267_vm2, %v1266_v24, 0.0  ;;  %v1403_v25 = vsel %vm1267_vm2, %v1265_v18, 0.0 }
 0x28b   :  { %v1382_v8 = vadd.f32 %v1381_v63, %v1380_v47  ;;  %v1398_v53 = vadd.f32 %v1397_v27, %v1396_v34  ;;  %v1405_v0 = vadd.f32 %v1404_v6, %v1403_v25  ;;  %v1393_v61 = vadd.f32 %v1392_v43, %v1391_v54 }
 0x28d   :  { %v1383_v5 = vrot.slane %v1382_v8, 1  ;;  %v1399_v11 = vrot.slane %v1398_v53, 2  ;;  %v1406_v37 = vrot.slane %v1405_v0, 4 }
 0x28f   :  { %v1384_v51 = vadd.f32 %v1383_v5, %v1382_v8  ;;  %v1400_v28 = vadd.f32 %v1399_v11, %v1398_v53  ;;  %v1407_v17 = vadd.f32 %v1406_v37, %v1405_v0 }
 0x291   :  { %v1453_v46 = vsel %vm1442_vm6, %v1384_v51, %v1452_v36  ;;  %v1401_v55 = vrot.slane %v1400_v28, 1  ;;  %v1408_v44 = vrot.slane %v1407_v17, 2 }
 0x292   :  { %v1454_v52 = vsel %vm1444_vm7, %v1393_v61, %v1453_v46 }
 0x293   :  { %v1402_v57 = vadd.f32 %v1401_v55, %v1400_v28  ;;  %v1409_v38 = vadd.f32 %v1408_v44, %v1407_v17 }
 0x295   :  { %v1410_v3 = vrot.slane %v1409_v38, 1  ;;  %v1455_v35 = vsel %vm1446_vm8, %v1402_v57, %v1454_v52 }
 0x297   :  { %v1411_v2 = vadd.f32 %v1410_v3, %v1409_v38 }
 0x299   :  { %v1456_v59 = vsel %vm1448_vm9, %v1411_v2, %v1455_v35 }
 0x29a   :  { %1689 = vmatmul.mubr.msk.f32.vlgmr.msra.gmra.mrb[32].mxu0 %vm1267_vm2, %v1456_v59 }
 0x36d   :  { %v1690_v7 = vpop.f32.mrb[32].mxu0 }
 0x36e   :  { %v1533_v60 = vadd.f32 %v1690_v7, %v1578_v49  ;;  %v1527_v45 = vpop.f32.mrb[33].mxu0 }
 0x36f   :  { %v1528_v56 = vadd.f32 %v1578_v49, %v1527_v45 }
 0x370   :  { %1538 = vst.msk [vmem:[%s2617_s7 + $0x8] sm:$0xff] %vm1536_vm10, %v1533_v60 }
 0x371   :  { %1537 = vst.msk [vmem:[%s2617_s7] sm:$0xff] %vm1536_vm10, %v1528_v56 }
 0x372   :  { %1543 = vsyncpa [#allocation3], 1 }

</bundles_post_ra>
